<compile_context>
chip_gen: v6e
topology: v6e:2x2x1
jax: 0.10.0
libtpu: 0.0.40
codegen_flags: <defaults>
</compile_context>

<pallas_src>
import functools
import math

import jax
import jax.numpy as jnp
from jax.experimental import pallas as pl
from jax.experimental.pallas import tpu as pltpu


def _choose_block_batch(B, S, H, in_bytes, vmem_budget_bytes, max_unroll=32):
    """Largest legal batch tile: divides B, keeps the (TB*S, H) ref block
    sublane-legal, fits a conservative double-buffered VMEM budget (safe on
    v7x's smaller VMEM), and keeps the unrolled per-batch epilogue small."""
    per_b = S * H * in_bytes          # ref input block
    per_b += H * S * 4                # projected-ref output block (f32)
    per_b += H * in_bytes + S * 4     # query block + logits block
    cap = max(1, vmem_budget_bytes // (2 * per_b))   # x2: double-buffered pipeline
    cap = min(cap, max_unroll, B)
    for tb in range(cap, 0, -1):
        if B % tb == 0 and (tb == B or (tb * S) % 8 == 0):
            return tb
    return B   # fallback: a single grid step is always legal


def _bahdanau_attn_kernel(q_ref, ref_ref, wq_t_ref, bq_ref, wr_t_ref, br_ref,
                          v_ref, refout_ref, logits_ref, *, use_tanh, C, TB, S, H):
    """One grid step == TB batch elements.

    Block shapes seen by the kernel:
      q_ref      [TB, 1, H]   queries
      ref_ref    [TB*S, H]    refs, batch*seq flattened (one big MXU matmul)
      wq_t_ref   [H, H]       W_query^T (pre-transposed in the wrapper, resident)
      bq_ref     [1, H]       f32
      wr_t_ref   [H, H]       W_ref^T (1x1 Conv1d == pointwise linear, resident)
      br_ref     [1, H]       f32
      v_ref      [1, H]       V row, f32
      refout_ref [TB, H, S]   projected ref, already in PyTorch's [B, H, S] layout
      logits_ref [TB, 1, S]   logits, lane-dense (S on lanes)
    """
    q = q_ref[...].reshape(TB, H)
    q_proj = jnp.dot(q, wq_t_ref[...],
                     preferred_element_type=jnp.float32) + bq_ref[...]      # [TB, H]  f32
    r_proj = jnp.dot(ref_ref[...], wr_t_ref[...],
                     preferred_element_type=jnp.float32) + br_ref[...]      # [TB*S, H] f32

    q_projT = q_proj.T                        # [H, TB] f32 (one XLU transpose per step)
    v_row = v_ref[...]                        # [1, H]  f32

    # Small static unroll over the batch tile (TB <= max_unroll).
    for b in range(TB):
        rT = r_proj[b * S:(b + 1) * S, :].T                     # [H, S] -- XLU slot is idle
        refout_ref[b] = rT.astype(refout_ref.dtype)             # PyTorch [B, H, S] layout
        t = jnp.tanh(rT + q_projT[:, b:b + 1])                  # [H, S] f32 (f32 EUP: v5e-safe)
        lrow = jnp.dot(v_row, t, preferred_element_type=jnp.float32)   # [1, S] on the MXU
        if use_tanh:
            lrow = C * jnp.tanh(lrow)
        logits_ref[b] = lrow.astype(logits_ref.dtype)           # lane-dense store


def bahdanau_attention(query, ref, w_query, b_query, w_ref, b_ref, v,
                       use_tanh=True, C=10.0, matmul_dtype=jnp.bfloat16,
                       block_batch=None, vmem_budget_bytes=8 * 1024 * 1024):
    """query: [B, H], ref: [B, S, H]. Returns (ref_out [B, H, S], logits [B, S])."""
    B, S, H = ref.shape
    in_bytes = jnp.dtype(matmul_dtype).itemsize
    TB = (block_batch if block_batch is not None
          else _choose_block_batch(B, S, H, in_bytes, vmem_budget_bytes))
    assert B % TB == 0 and (TB == B or (TB * S) % 8 == 0), (B, S, TB)

    # Host-side layout prep (free / fused into the surrounding XLA program):
    #   * pre-transpose the weights so the kernel never transposes an [H, H] tile,
    #   * flatten ref to [B*S, H] (contiguous -> metadata-only reshape) so one
    #     grid step feeds one big MXU matmul,
    #   * biases / V stay f32 for the f32 epilogue (v5e-safe).
    wq_t = jnp.asarray(w_query.T, matmul_dtype)
    wr_t = jnp.asarray(w_ref.T, matmul_dtype)
    q3 = query.reshape(B, 1, H).astype(matmul_dtype)
    ref_flat = ref.reshape(B * S, H).astype(matmul_dtype)
    bq = b_query.reshape(1, H).astype(jnp.float32)
    br = b_ref.reshape(1, H).astype(jnp.float32)
    v_row = v.reshape(1, H).astype(jnp.float32)

    kernel = functools.partial(_bahdanau_attn_kernel, use_tanh=use_tanh,
                               C=float(C), TB=TB, S=S, H=H)

    flops = 2 * B * H * H + 2 * B * S * H * H + 2 * B * S * H
    transcendentals = B * S * H + (B * S if use_tanh else 0)
    bytes_accessed = (in_bytes * (B * H + B * S * H + 2 * H * H)
                      + 4 * (3 * H + B * H * S + B * S))

    grid_spec = pltpu.PrefetchScalarGridSpec(
        num_scalar_prefetch=0,
        grid=(B // TB,),
        in_specs=[
            pl.BlockSpec((TB, 1, H), lambda b: (b, 0, 0)),    # queries
            pl.BlockSpec((TB * S, H), lambda b: (b, 0)),      # refs (batch*seq flattened)
            pl.BlockSpec((H, H), lambda b: (0, 0)),           # W_query^T  (VMEM-resident)
            pl.BlockSpec((1, H), lambda b: (0, 0)),           # b_query    (resident)
            pl.BlockSpec((H, H), lambda b: (0, 0)),           # W_ref^T    (resident)
            pl.BlockSpec((1, H), lambda b: (0, 0)),           # b_ref      (resident)
            pl.BlockSpec((1, H), lambda b: (0, 0)),           # V row      (resident)
        ],
        out_specs=(
            pl.BlockSpec((TB, H, S), lambda b: (b, 0, 0)),    # projected ref, [B, H, S]
            pl.BlockSpec((TB, 1, S), lambda b: (b, 0, 0)),    # logits, lane-dense
        ),
    )

    ref_out, logits3 = pl.pallas_call(
        kernel,
        out_shape=(jax.ShapeDtypeStruct((B, H, S), jnp.float32),
                   jax.ShapeDtypeStruct((B, 1, S), jnp.float32)),
        grid_spec=grid_spec,
        compiler_params=pltpu.CompilerParams(
            dimension_semantics=("parallel",)),
        cost_estimate=pl.CostEstimate(flops=flops,
                                      transcendentals=transcendentals,
                                      bytes_accessed=bytes_accessed),
    )(q3, ref_flat, wq_t, bq, wr_t, br, v_row)

    # Kernel already emits the PyTorch [B, H, S] layout; squeezing the logits'
    # unit axis is a free reshape.
    return ref_out, logits3[:, 0, :]


def _reference(query, ref, w_query, b_query, w_ref, b_ref, v, use_tanh, C):
    q_proj = query @ w_query.T + b_query                        # [B, H]
    r_proj = jnp.einsum('bsh,kh->bsk', ref, w_ref) + b_ref      # [B, S, H]
    t = jnp.tanh(q_proj[:, None, :] + r_proj)
    logits = jnp.sum(t * v[None, None, :], axis=-1)
    if use_tanh:
        logits = C * jnp.tanh(logits)
    return jnp.transpose(r_proj, (0, 2, 1)), logits


if __name__ == "__main__":
    # hidden_size = 128 in the PyTorch module; small batch / seq_len for the test.
    B, S, H = 8, 8, 128
    use_tanh_flag, C = True, 10.0

    key = jax.random.PRNGKey(0)
    k_q, k_r, k_wq, k_bq, k_wr, k_br, k_v = jax.random.split(key, 7)

    scale = 1.0 / math.sqrt(H)
    query = jax.random.normal(k_q, (B, H), jnp.float32)
    ref = jax.random.normal(k_r, (B, S, H), jnp.float32)
    w_query = jax.random.uniform(k_wq, (H, H), jnp.float32, -scale, scale)
    b_query = jax.random.uniform(k_bq, (H,), jnp.float32, -scale, scale)
    w_ref = jax.random.uniform(k_wr, (H, H), jnp.float32, -scale, scale)
    b_ref = jax.random.uniform(k_br, (H,), jnp.float32, -scale, scale)
    v = jax.random.uniform(k_v, (H,), jnp.float32, -scale, scale)

    ref_out_exp, logits_exp = _reference(query, ref, w_query, b_query,
                                         w_ref, b_ref, v, use_tanh_flag, C)

    # 1) f32 MXU operands: tight numerical check (single grid step, auto TB=B).
    ro32, lg32 = bahdanau_attention(query, ref, w_query, b_query, w_ref, b_ref, v,
                                    use_tanh=use_tanh_flag, C=C,
                                    matmul_dtype=jnp.float32)
    jax.block_until_ready((ro32, lg32))
    assert ro32.shape == (B, H, S) and lg32.shape == (B, S)
    assert jnp.allclose(ro32, ref_out_exp, atol=2e-4, rtol=2e-4)
    assert jnp.allclose(lg32, logits_exp, atol=2e-4, rtol=2e-4)

    # 2) bf16 MXU operands (the recommended v6e/v7x config), multi-step grid
    #    (block_batch=4 -> grid of 2). Tolerances loosened for bf16 operand
    #    rounding; C*tanh amplifies absolute error on the logits near zero.
    robf, lgbf = bahdanau_attention(query, ref, w_query, b_query, w_ref, b_ref, v,
                                    use_tanh=use_tanh_flag, C=C,
                                    matmul_dtype=jnp.bfloat16, block_batch=4)
    jax.block_until_ready((robf, lgbf))
    assert robf.shape == (B, H, S) and lgbf.shape == (B, S)
    assert jnp.allclose(robf, ref_out_exp, atol=5e-2, rtol=5e-2)
    assert jnp.allclose(lgbf, logits_exp, atol=1e-1, rtol=5e-2)

    print("KERNEL_OK")
</pallas_src>

<mosaic_0001>
module attributes {stable_mosaic.version = 11 : i64} {
  func.func @_bahdanau_attn_kernel(%arg0: i32, %arg1: memref<8x1x128xf32, #tpu.memory_space<vmem>>, %arg2: memref<64x128xf32, #tpu.memory_space<vmem>>, %arg3: memref<128x128xf32, #tpu.memory_space<vmem>>, %arg4: memref<1x128xf32, #tpu.memory_space<vmem>>, %arg5: memref<128x128xf32, #tpu.memory_space<vmem>>, %arg6: memref<1x128xf32, #tpu.memory_space<vmem>>, %arg7: memref<1x128xf32, #tpu.memory_space<vmem>>, %arg8: memref<8x128x8xf32, #tpu.memory_space<vmem>>, %arg9: memref<8x1x8xf32, #tpu.memory_space<vmem>>) attributes {dimension_semantics = [#tpu.dimension_semantics<parallel>], iteration_bounds = array<i64: 1>, scalar_prefetch = 0 : i64, scratch_operands = 0 : i64, tpu.core_type = #tpu.core_type<tc>, window_params = [{transform_indices = @transform_0, window_bounds = array<i64: 8, 1, 128>}, {transform_indices = @transform_1, window_bounds = array<i64: 64, 128>}, {pipeline_mode = #tpu.pipeline_mode<synchronous>, transform_indices = @transform_2, window_bounds = array<i64: 128, 128>}, {pipeline_mode = #tpu.pipeline_mode<synchronous>, transform_indices = @transform_3, window_bounds = array<i64: 1, 128>}, {pipeline_mode = #tpu.pipeline_mode<synchronous>, transform_indices = @transform_4, window_bounds = array<i64: 128, 128>}, {pipeline_mode = #tpu.pipeline_mode<synchronous>, transform_indices = @transform_5, window_bounds = array<i64: 1, 128>}, {pipeline_mode = #tpu.pipeline_mode<synchronous>, transform_indices = @transform_6, window_bounds = array<i64: 1, 128>}, {transform_indices = @transform_7, window_bounds = array<i64: 8, 128, 8>}, {transform_indices = @transform_8, window_bounds = array<i64: 8, 1, 8>}]} {
    %c0 = arith.constant 0 : index
    %c0_0 = arith.constant 0 : index
    %c0_1 = arith.constant 0 : index
    %0 = vector.load %arg1[%c0, %c0_0, %c0_1] : memref<8x1x128xf32, #tpu.memory_space<vmem>>, vector<8x1x128xf32>
    %1 = vector.shape_cast %0 : vector<8x1x128xf32> to vector<8x128xf32>
    %c0_2 = arith.constant 0 : index
    %c0_3 = arith.constant 0 : index
    %2 = vector.load %arg3[%c0_2, %c0_3] : memref<128x128xf32, #tpu.memory_space<vmem>>, vector<128x128xf32>
    %cst = arith.constant dense<0.000000e+00> : vector<8x128xf32>
    %3 = tpu.matmul %1, %2, %cst {dimension_numbers = #tpu.dot_dimension_numbers<[1], [0], [0], [1], [0, 0, 1, 1], [], []>} : vector<8x128xf32>, vector<128x128xf32>, vector<8x128xf32> -> vector<8x128xf32>
    %c0_4 = arith.constant 0 : index
    %c0_5 = arith.constant 0 : index
    %4 = vector.load %arg4[%c0_4, %c0_5] : memref<1x128xf32, #tpu.memory_space<vmem>>, vector<1x128xf32>
    %5 = vector.broadcast %4 : vector<1x128xf32> to vector<8x128xf32>
    %6 = arith.addf %3, %5 : vector<8x128xf32>
    %c0_6 = arith.constant 0 : index
    %c0_7 = arith.constant 0 : index
    %7 = vector.load %arg2[%c0_6, %c0_7] : memref<64x128xf32, #tpu.memory_space<vmem>>, vector<64x128xf32>
    %c0_8 = arith.constant 0 : index
    %c0_9 = arith.constant 0 : index
    %8 = vector.load %arg5[%c0_8, %c0_9] : memref<128x128xf32, #tpu.memory_space<vmem>>, vector<128x128xf32>
    %cst_10 = arith.constant dense<0.000000e+00> : vector<64x128xf32>
    %9 = tpu.matmul %7, %8, %cst_10 {dimension_numbers = #tpu.dot_dimension_numbers<[1], [0], [0], [1], [0, 0, 1, 1], [], []>} : vector<64x128xf32>, vector<128x128xf32>, vector<64x128xf32> -> vector<64x128xf32>
    %c0_11 = arith.constant 0 : index
    %c0_12 = arith.constant 0 : index
    %10 = vector.load %arg6[%c0_11, %c0_12] : memref<1x128xf32, #tpu.memory_space<vmem>>, vector<1x128xf32>
    %11 = vector.broadcast %10 : vector<1x128xf32> to vector<64x128xf32>
    %12 = arith.addf %9, %11 : vector<64x128xf32>
    %13 = tpu.transpose %6, [1, 0] : vector<8x128xf32> -> vector<128x8xf32>
    %c0_13 = arith.constant 0 : index
    %c0_14 = arith.constant 0 : index
    %14 = vector.load %arg7[%c0_13, %c0_14] : memref<1x128xf32, #tpu.memory_space<vmem>>, vector<1x128xf32>
    %15 = vector.extract_strided_slice %12 {offsets = [0, 0], sizes = [8, 128], strides = [1, 1]} : vector<64x128xf32> to vector<8x128xf32>
    %16 = tpu.transpose %15, [1, 0] : vector<8x128xf32> -> vector<128x8xf32>
    %c0_15 = arith.constant 0 : index
    %c0_16 = arith.constant 0 : index
    %c0_17 = arith.constant 0 : index
    %17 = vector.load %arg8[%c0_15, %c0_16, %c0_17] : memref<8x128x8xf32, #tpu.memory_space<vmem>>, vector<1x128x8xf32>
    %18 = vector.shape_cast %17 : vector<1x128x8xf32> to vector<128x8xf32>
    %19 = vector.shape_cast %16 : vector<128x8xf32> to vector<1x128x8xf32>
    tpu.vector_store %arg8[%c0_15, %c0_16, %c0_17], %19 {strides = array<i32>} : memref<8x128x8xf32, #tpu.memory_space<vmem>>, vector<1x128x8xf32>,
    %20 = vector.extract_strided_slice %13 {offsets = [0, 0], sizes = [128, 1], strides = [1, 1]} : vector<128x8xf32> to vector<128x1xf32>
    %21 = vector.broadcast %20 : vector<128x1xf32> to vector<128x8xf32>
    %22 = arith.addf %16, %21 : vector<128x8xf32>
    %23 = math.tanh %22 : vector<128x8xf32>
    %cst_18 = arith.constant dense<0.000000e+00> : vector<1x8xf32>
    %24 = tpu.matmul %14, %23, %cst_18 {dimension_numbers = #tpu.dot_dimension_numbers<[1], [0], [0], [1], [0, 0, 1, 1], [], []>} : vector<1x128xf32>, vector<128x8xf32>, vector<1x8xf32> -> vector<1x8xf32>
    %25 = math.tanh %24 : vector<1x8xf32>
    %cst_19 = arith.constant 1.000000e+01 : f32
    %26 = vector.broadcast %cst_19 : f32 to vector<1x8xf32>
    %27 = arith.mulf %26, %25 : vector<1x8xf32>
    %c0_20 = arith.constant 0 : index
    %c0_21 = arith.constant 0 : index
    %c0_22 = arith.constant 0 : index
    %28 = vector.load %arg9[%c0_20, %c0_21, %c0_22] : memref<8x1x8xf32, #tpu.memory_space<vmem>>, vector<1x1x8xf32>
    %29 = vector.shape_cast %28 : vector<1x1x8xf32> to vector<1x8xf32>
    %30 = vector.shape_cast %27 : vector<1x8xf32> to vector<1x1x8xf32>
    tpu.vector_store %arg9[%c0_20, %c0_21, %c0_22], %30 {strides = array<i32>} : memref<8x1x8xf32, #tpu.memory_space<vmem>>, vector<1x1x8xf32>,
    %31 = vector.extract_strided_slice %12 {offsets = [8, 0], sizes = [8, 128], strides = [1, 1]} : vector<64x128xf32> to vector<8x128xf32>
    %32 = tpu.transpose %31, [1, 0] : vector<8x128xf32> -> vector<128x8xf32>
    %c1 = arith.constant 1 : index
    %c0_23 = arith.constant 0 : index
    %c0_24 = arith.constant 0 : index
    %33 = vector.load %arg8[%c1, %c0_23, %c0_24] : memref<8x128x8xf32, #tpu.memory_space<vmem>>, vector<1x128x8xf32>
    %34 = vector.shape_cast %33 : vector<1x128x8xf32> to vector<128x8xf32>
    %35 = vector.shape_cast %32 : vector<128x8xf32> to vector<1x128x8xf32>
    tpu.vector_store %arg8[%c1, %c0_23, %c0_24], %35 {strides = array<i32>} : memref<8x128x8xf32, #tpu.memory_space<vmem>>, vector<1x128x8xf32>,
    %36 = vector.extract_strided_slice %13 {offsets = [0, 1], sizes = [128, 1], strides = [1, 1]} : vector<128x8xf32> to vector<128x1xf32>
    %37 = vector.broadcast %36 : vector<128x1xf32> to vector<128x8xf32>
    %38 = arith.addf %32, %37 : vector<128x8xf32>
    %39 = math.tanh %38 : vector<128x8xf32>
    %cst_25 = arith.constant dense<0.000000e+00> : vector<1x8xf32>
    %40 = tpu.matmul %14, %39, %cst_25 {dimension_numbers = #tpu.dot_dimension_numbers<[1], [0], [0], [1], [0, 0, 1, 1], [], []>} : vector<1x128xf32>, vector<128x8xf32>, vector<1x8xf32> -> vector<1x8xf32>
    %41 = math.tanh %40 : vector<1x8xf32>
    %cst_26 = arith.constant 1.000000e+01 : f32
    %42 = vector.broadcast %cst_26 : f32 to vector<1x8xf32>
    %43 = arith.mulf %42, %41 : vector<1x8xf32>
    %c1_27 = arith.constant 1 : index
    %c0_28 = arith.constant 0 : index
    %c0_29 = arith.constant 0 : index
    %44 = vector.load %arg9[%c1_27, %c0_28, %c0_29] : memref<8x1x8xf32, #tpu.memory_space<vmem>>, vector<1x1x8xf32>
    %45 = vector.shape_cast %44 : vector<1x1x8xf32> to vector<1x8xf32>
    %46 = vector.shape_cast %43 : vector<1x8xf32> to vector<1x1x8xf32>
    tpu.vector_store %arg9[%c1_27, %c0_28, %c0_29], %46 {strides = array<i32>} : memref<8x1x8xf32, #tpu.memory_space<vmem>>, vector<1x1x8xf32>,
    %47 = vector.extract_strided_slice %12 {offsets = [16, 0], sizes = [8, 128], strides = [1, 1]} : vector<64x128xf32> to vector<8x128xf32>
    %48 = tpu.transpose %47, [1, 0] : vector<8x128xf32> -> vector<128x8xf32>
    %c2 = arith.constant 2 : index
    %c0_30 = arith.constant 0 : index
    %c0_31 = arith.constant 0 : index
    %49 = vector.load %arg8[%c2, %c0_30, %c0_31] : memref<8x128x8xf32, #tpu.memory_space<vmem>>, vector<1x128x8xf32>
    %50 = vector.shape_cast %49 : vector<1x128x8xf32> to vector<128x8xf32>
    %51 = vector.shape_cast %48 : vector<128x8xf32> to vector<1x128x8xf32>
    tpu.vector_store %arg8[%c2, %c0_30, %c0_31], %51 {strides = array<i32>} : memref<8x128x8xf32, #tpu.memory_space<vmem>>, vector<1x128x8xf32>,
    %52 = vector.extract_strided_slice %13 {offsets = [0, 2], sizes = [128, 1], strides = [1, 1]} : vector<128x8xf32> to vector<128x1xf32>
    %53 = vector.broadcast %52 : vector<128x1xf32> to vector<128x8xf32>
    %54 = arith.addf %48, %53 : vector<128x8xf32>
    %55 = math.tanh %54 : vector<128x8xf32>
    %cst_32 = arith.constant dense<0.000000e+00> : vector<1x8xf32>
    %56 = tpu.matmul %14, %55, %cst_32 {dimension_numbers = #tpu.dot_dimension_numbers<[1], [0], [0], [1], [0, 0, 1, 1], [], []>} : vector<1x128xf32>, vector<128x8xf32>, vector<1x8xf32> -> vector<1x8xf32>
    %57 = math.tanh %56 : vector<1x8xf32>
    %cst_33 = arith.constant 1.000000e+01 : f32
    %58 = vector.broadcast %cst_33 : f32 to vector<1x8xf32>
    %59 = arith.mulf %58, %57 : vector<1x8xf32>
    %c2_34 = arith.constant 2 : index
    %c0_35 = arith.constant 0 : index
    %c0_36 = arith.constant 0 : index
    %60 = vector.load %arg9[%c2_34, %c0_35, %c0_36] : memref<8x1x8xf32, #tpu.memory_space<vmem>>, vector<1x1x8xf32>
    %61 = vector.shape_cast %60 : vector<1x1x8xf32> to vector<1x8xf32>
    %62 = vector.shape_cast %59 : vector<1x8xf32> to vector<1x1x8xf32>
    tpu.vector_store %arg9[%c2_34, %c0_35, %c0_36], %62 {strides = array<i32>} : memref<8x1x8xf32, #tpu.memory_space<vmem>>, vector<1x1x8xf32>,
    %63 = vector.extract_strided_slice %12 {offsets = [24, 0], sizes = [8, 128], strides = [1, 1]} : vector<64x128xf32> to vector<8x128xf32>
    %64 = tpu.transpose %63, [1, 0] : vector<8x128xf32> -> vector<128x8xf32>
    %c3 = arith.constant 3 : index
    %c0_37 = arith.constant 0 : index
    %c0_38 = arith.constant 0 : index
    %65 = vector.load %arg8[%c3, %c0_37, %c0_38] : memref<8x128x8xf32, #tpu.memory_space<vmem>>, vector<1x128x8xf32>
    %66 = vector.shape_cast %65 : vector<1x128x8xf32> to vector<128x8xf32>
    %67 = vector.shape_cast %64 : vector<128x8xf32> to vector<1x128x8xf32>
    tpu.vector_store %arg8[%c3, %c0_37, %c0_38], %67 {strides = array<i32>} : memref<8x128x8xf32, #tpu.memory_space<vmem>>, vector<1x128x8xf32>,
    %68 = vector.extract_strided_slice %13 {offsets = [0, 3], sizes = [128, 1], strides = [1, 1]} : vector<128x8xf32> to vector<128x1xf32>
    %69 = vector.broadcast %68 : vector<128x1xf32> to vector<128x8xf32>
    %70 = arith.addf %64, %69 : vector<128x8xf32>
    %71 = math.tanh %70 : vector<128x8xf32>
    %cst_39 = arith.constant dense<0.000000e+00> : vector<1x8xf32>
    %72 = tpu.matmul %14, %71, %cst_39 {dimension_numbers = #tpu.dot_dimension_numbers<[1], [0], [0], [1], [0, 0, 1, 1], [], []>} : vector<1x128xf32>, vector<128x8xf32>, vector<1x8xf32> -> vector<1x8xf32>
    %73 = math.tanh %72 : vector<1x8xf32>
    %cst_40 = arith.constant 1.000000e+01 : f32
    %74 = vector.broadcast %cst_40 : f32 to vector<1x8xf32>
    %75 = arith.mulf %74, %73 : vector<1x8xf32>
    %c3_41 = arith.constant 3 : index
    %c0_42 = arith.constant 0 : index
    %c0_43 = arith.constant 0 : index
    %76 = vector.load %arg9[%c3_41, %c0_42, %c0_43] : memref<8x1x8xf32, #tpu.memory_space<vmem>>, vector<1x1x8xf32>
    %77 = vector.shape_cast %76 : vector<1x1x8xf32> to vector<1x8xf32>
    %78 = vector.shape_cast %75 : vector<1x8xf32> to vector<1x1x8xf32>
    tpu.vector_store %arg9[%c3_41, %c0_42, %c0_43], %78 {strides = array<i32>} : memref<8x1x8xf32, #tpu.memory_space<vmem>>, vector<1x1x8xf32>,
    %79 = vector.extract_strided_slice %12 {offsets = [32, 0], sizes = [8, 128], strides = [1, 1]} : vector<64x128xf32> to vector<8x128xf32>
    %80 = tpu.transpose %79, [1, 0] : vector<8x128xf32> -> vector<128x8xf32>
    %c4 = arith.constant 4 : index
    %c0_44 = arith.constant 0 : index
    %c0_45 = arith.constant 0 : index
    %81 = vector.load %arg8[%c4, %c0_44, %c0_45] : memref<8x128x8xf32, #tpu.memory_space<vmem>>, vector<1x128x8xf32>
    %82 = vector.shape_cast %81 : vector<1x128x8xf32> to vector<128x8xf32>
    %83 = vector.shape_cast %80 : vector<128x8xf32> to vector<1x128x8xf32>
    tpu.vector_store %arg8[%c4, %c0_44, %c0_45], %83 {strides = array<i32>} : memref<8x128x8xf32, #tpu.memory_space<vmem>>, vector<1x128x8xf32>,
    %84 = vector.extract_strided_slice %13 {offsets = [0, 4], sizes = [128, 1], strides = [1, 1]} : vector<128x8xf32> to vector<128x1xf32>
    %85 = vector.broadcast %84 : vector<128x1xf32> to vector<128x8xf32>
    %86 = arith.addf %80, %85 : vector<128x8xf32>
    %87 = math.tanh %86 : vector<128x8xf32>
    %cst_46 = arith.constant dense<0.000000e+00> : vector<1x8xf32>
    %88 = tpu.matmul %14, %87, %cst_46 {dimension_numbers = #tpu.dot_dimension_numbers<[1], [0], [0], [1], [0, 0, 1, 1], [], []>} : vector<1x128xf32>, vector<128x8xf32>, vector<1x8xf32> -> vector<1x8xf32>
    %89 = math.tanh %88 : vector<1x8xf32>
    %cst_47 = arith.constant 1.000000e+01 : f32
    %90 = vector.broadcast %cst_47 : f32 to vector<1x8xf32>
    %91 = arith.mulf %90, %89 : vector<1x8xf32>
    %c4_48 = arith.constant 4 : index
    %c0_49 = arith.constant 0 : index
    %c0_50 = arith.constant 0 : index
    %92 = vector.load %arg9[%c4_48, %c0_49, %c0_50] : memref<8x1x8xf32, #tpu.memory_space<vmem>>, vector<1x1x8xf32>
    %93 = vector.shape_cast %92 : vector<1x1x8xf32> to vector<1x8xf32>
    %94 = vector.shape_cast %91 : vector<1x8xf32> to vector<1x1x8xf32>
    tpu.vector_store %arg9[%c4_48, %c0_49, %c0_50], %94 {strides = array<i32>} : memref<8x1x8xf32, #tpu.memory_space<vmem>>, vector<1x1x8xf32>,
    %95 = vector.extract_strided_slice %12 {offsets = [40, 0], sizes = [8, 128], strides = [1, 1]} : vector<64x128xf32> to vector<8x128xf32>
    %96 = tpu.transpose %95, [1, 0] : vector<8x128xf32> -> vector<128x8xf32>
    %c5 = arith.constant 5 : index
    %c0_51 = arith.constant 0 : index
    %c0_52 = arith.constant 0 : index
    %97 = vector.load %arg8[%c5, %c0_51, %c0_52] : memref<8x128x8xf32, #tpu.memory_space<vmem>>, vector<1x128x8xf32>
    %98 = vector.shape_cast %97 : vector<1x128x8xf32> to vector<128x8xf32>
    %99 = vector.shape_cast %96 : vector<128x8xf32> to vector<1x128x8xf32>
    tpu.vector_store %arg8[%c5, %c0_51, %c0_52], %99 {strides = array<i32>} : memref<8x128x8xf32, #tpu.memory_space<vmem>>, vector<1x128x8xf32>,
    %100 = vector.extract_strided_slice %13 {offsets = [0, 5], sizes = [128, 1], strides = [1, 1]} : vector<128x8xf32> to vector<128x1xf32>
    %101 = vector.broadcast %100 : vector<128x1xf32> to vector<128x8xf32>
    %102 = arith.addf %96, %101 : vector<128x8xf32>
    %103 = math.tanh %102 : vector<128x8xf32>
    %cst_53 = arith.constant dense<0.000000e+00> : vector<1x8xf32>
    %104 = tpu.matmul %14, %103, %cst_53 {dimension_numbers = #tpu.dot_dimension_numbers<[1], [0], [0], [1], [0, 0, 1, 1], [], []>} : vector<1x128xf32>, vector<128x8xf32>, vector<1x8xf32> -> vector<1x8xf32>
    %105 = math.tanh %104 : vector<1x8xf32>
    %cst_54 = arith.constant 1.000000e+01 : f32
    %106 = vector.broadcast %cst_54 : f32 to vector<1x8xf32>
    %107 = arith.mulf %106, %105 : vector<1x8xf32>
    %c5_55 = arith.constant 5 : index
    %c0_56 = arith.constant 0 : index
    %c0_57 = arith.constant 0 : index
    %108 = vector.load %arg9[%c5_55, %c0_56, %c0_57] : memref<8x1x8xf32, #tpu.memory_space<vmem>>, vector<1x1x8xf32>
    %109 = vector.shape_cast %108 : vector<1x1x8xf32> to vector<1x8xf32>
    %110 = vector.shape_cast %107 : vector<1x8xf32> to vector<1x1x8xf32>
    tpu.vector_store %arg9[%c5_55, %c0_56, %c0_57], %110 {strides = array<i32>} : memref<8x1x8xf32, #tpu.memory_space<vmem>>, vector<1x1x8xf32>,
    %111 = vector.extract_strided_slice %12 {offsets = [48, 0], sizes = [8, 128], strides = [1, 1]} : vector<64x128xf32> to vector<8x128xf32>
    %112 = tpu.transpose %111, [1, 0] : vector<8x128xf32> -> vector<128x8xf32>
    %c6 = arith.constant 6 : index
    %c0_58 = arith.constant 0 : index
    %c0_59 = arith.constant 0 : index
    %113 = vector.load %arg8[%c6, %c0_58, %c0_59] : memref<8x128x8xf32, #tpu.memory_space<vmem>>, vector<1x128x8xf32>
    %114 = vector.shape_cast %113 : vector<1x128x8xf32> to vector<128x8xf32>
    %115 = vector.shape_cast %112 : vector<128x8xf32> to vector<1x128x8xf32>
    tpu.vector_store %arg8[%c6, %c0_58, %c0_59], %115 {strides = array<i32>} : memref<8x128x8xf32, #tpu.memory_space<vmem>>, vector<1x128x8xf32>,
    %116 = vector.extract_strided_slice %13 {offsets = [0, 6], sizes = [128, 1], strides = [1, 1]} : vector<128x8xf32> to vector<128x1xf32>
    %117 = vector.broadcast %116 : vector<128x1xf32> to vector<128x8xf32>
    %118 = arith.addf %112, %117 : vector<128x8xf32>
    %119 = math.tanh %118 : vector<128x8xf32>
    %cst_60 = arith.constant dense<0.000000e+00> : vector<1x8xf32>
    %120 = tpu.matmul %14, %119, %cst_60 {dimension_numbers = #tpu.dot_dimension_numbers<[1], [0], [0], [1], [0, 0, 1, 1], [], []>} : vector<1x128xf32>, vector<128x8xf32>, vector<1x8xf32> -> vector<1x8xf32>
    %121 = math.tanh %120 : vector<1x8xf32>
    %cst_61 = arith.constant 1.000000e+01 : f32
    %122 = vector.broadcast %cst_61 : f32 to vector<1x8xf32>
    %123 = arith.mulf %122, %121 : vector<1x8xf32>
    %c6_62 = arith.constant 6 : index
    %c0_63 = arith.constant 0 : index
    %c0_64 = arith.constant 0 : index
    %124 = vector.load %arg9[%c6_62, %c0_63, %c0_64] : memref<8x1x8xf32, #tpu.memory_space<vmem>>, vector<1x1x8xf32>
    %125 = vector.shape_cast %124 : vector<1x1x8xf32> to vector<1x8xf32>
    %126 = vector.shape_cast %123 : vector<1x8xf32> to vector<1x1x8xf32>
    tpu.vector_store %arg9[%c6_62, %c0_63, %c0_64], %126 {strides = array<i32>} : memref<8x1x8xf32, #tpu.memory_space<vmem>>, vector<1x1x8xf32>,
    %127 = vector.extract_strided_slice %12 {offsets = [56, 0], sizes = [8, 128], strides = [1, 1]} : vector<64x128xf32> to vector<8x128xf32>
    %128 = tpu.transpose %127, [1, 0] : vector<8x128xf32> -> vector<128x8xf32>
    %c7 = arith.constant 7 : index
    %c0_65 = arith.constant 0 : index
    %c0_66 = arith.constant 0 : index
    %129 = vector.load %arg8[%c7, %c0_65, %c0_66] : memref<8x128x8xf32, #tpu.memory_space<vmem>>, vector<1x128x8xf32>
    %130 = vector.shape_cast %129 : vector<1x128x8xf32> to vector<128x8xf32>
    %131 = vector.shape_cast %128 : vector<128x8xf32> to vector<1x128x8xf32>
    tpu.vector_store %arg8[%c7, %c0_65, %c0_66], %131 {strides = array<i32>} : memref<8x128x8xf32, #tpu.memory_space<vmem>>, vector<1x128x8xf32>,
    %132 = vector.extract_strided_slice %13 {offsets = [0, 7], sizes = [128, 1], strides = [1, 1]} : vector<128x8xf32> to vector<128x1xf32>
    %133 = vector.broadcast %132 : vector<128x1xf32> to vector<128x8xf32>
    %134 = arith.addf %128, %133 : vector<128x8xf32>
    %135 = math.tanh %134 : vector<128x8xf32>
    %cst_67 = arith.constant dense<0.000000e+00> : vector<1x8xf32>
    %136 = tpu.matmul %14, %135, %cst_67 {dimension_numbers = #tpu.dot_dimension_numbers<[1], [0], [0], [1], [0, 0, 1, 1], [], []>} : vector<1x128xf32>, vector<128x8xf32>, vector<1x8xf32> -> vector<1x8xf32>
    %137 = math.tanh %136 : vector<1x8xf32>
    %cst_68 = arith.constant 1.000000e+01 : f32
    %138 = vector.broadcast %cst_68 : f32 to vector<1x8xf32>
    %139 = arith.mulf %138, %137 : vector<1x8xf32>
    %c7_69 = arith.constant 7 : index
    %c0_70 = arith.constant 0 : index
    %c0_71 = arith.constant 0 : index
    %140 = vector.load %arg9[%c7_69, %c0_70, %c0_71] : memref<8x1x8xf32, #tpu.memory_space<vmem>>, vector<1x1x8xf32>
    %141 = vector.shape_cast %140 : vector<1x1x8xf32> to vector<1x8xf32>
    %142 = vector.shape_cast %139 : vector<1x8xf32> to vector<1x1x8xf32>
    tpu.vector_store %arg9[%c7_69, %c0_70, %c0_71], %142 {strides = array<i32>} : memref<8x1x8xf32, #tpu.memory_space<vmem>>, vector<1x1x8xf32>,
    return
  }
  func.func @transform_0(%arg0: i32) -> (i32, i32, i32) {
    %c0_i32 = arith.constant 0 : i32
    %c0_i32_0 = arith.constant 0 : i32
    %c0_i32_1 = arith.constant 0 : i32
    return %arg0, %c0_i32, %c0_i32_0 : i32, i32, i32
  }
  func.func @transform_1(%arg0: i32) -> (i32, i32) {
    %c0_i32 = arith.constant 0 : i32
    %c0_i32_0 = arith.constant 0 : i32
    return %arg0, %c0_i32 : i32, i32
  }
  func.func @transform_2(%arg0: i32) -> (i32, i32) {
    %c0_i32 = arith.constant 0 : i32
    %c0_i32_0 = arith.constant 0 : i32
    %c0_i32_1 = arith.constant 0 : i32
    return %c0_i32, %c0_i32_0 : i32, i32
  }
  func.func @transform_3(%arg0: i32) -> (i32, i32) {
    %c0_i32 = arith.constant 0 : i32
    %c0_i32_0 = arith.constant 0 : i32
    %c0_i32_1 = arith.constant 0 : i32
    return %c0_i32, %c0_i32_0 : i32, i32
  }
  func.func @transform_4(%arg0: i32) -> (i32, i32) {
    %c0_i32 = arith.constant 0 : i32
    %c0_i32_0 = arith.constant 0 : i32
    %c0_i32_1 = arith.constant 0 : i32
    return %c0_i32, %c0_i32_0 : i32, i32
  }
  func.func @transform_5(%arg0: i32) -> (i32, i32) {
    %c0_i32 = arith.constant 0 : i32
    %c0_i32_0 = arith.constant 0 : i32
    %c0_i32_1 = arith.constant 0 : i32
    return %c0_i32, %c0_i32_0 : i32, i32
  }
  func.func @transform_6(%arg0: i32) -> (i32, i32) {
    %c0_i32 = arith.constant 0 : i32
    %c0_i32_0 = arith.constant 0 : i32
    %c0_i32_1 = arith.constant 0 : i32
    return %c0_i32, %c0_i32_0 : i32, i32
  }
  func.func @transform_7(%arg0: i32) -> (i32, i32, i32) {
    %c0_i32 = arith.constant 0 : i32
    %c0_i32_0 = arith.constant 0 : i32
    %c0_i32_1 = arith.constant 0 : i32
    return %arg0, %c0_i32, %c0_i32_0 : i32, i32, i32
  }
  func.func @transform_8(%arg0: i32) -> (i32, i32, i32) {
    %c0_i32 = arith.constant 0 : i32
    %c0_i32_0 = arith.constant 0 : i32
    %c0_i32_1 = arith.constant 0 : i32
    return %arg0, %c0_i32, %c0_i32_0 : i32, i32, i32
  }
}

</mosaic_0001>

<bundles_post_ra>
// kernel: tpu_custom_call.1
= control target key start
LH: loop header
LB: loop body
LE: loop exit
PB: predicated region body
PF: predicated region fallthrough
CT: control target
= control target key end

     0   :  { %14 = vsyncpa [#allocation3], 0  ;;  %s4990_s0 = inlined_call_operand.hbm [shape: f32[8,1,128], index: 0, kind: input, shape index: {}]   ;;  %s4991_s1 = inlined_call_operand.hbm [shape: f32[64,128], index: 1, kind: input, shape index: {}]   ;;  %s4992_s2 = inlined_call_operand.hbm [shape: f32[128,128], index: 2, kind: input, shape index: {}]   ;;  %s4993_s3 = inlined_call_operand.vmem [shape: f32[1,128], index: 3, kind: input, shape index: {}]   ;;  %s4994_s4 = inlined_call_operand.hbm [shape: f32[128,128], index: 4, kind: input, shape index: {}]   ;;  %s4995_s5 = inlined_call_operand.vmem [shape: f32[1,128], index: 5, kind: input, shape index: {}]   ;;  %s4996_s6 = inlined_call_operand.vmem [shape: f32[1,128], index: 6, kind: input, shape index: {}]   ;;  %s4997_s7 = inlined_call_operand.vmem [shape: f32[8,128,8], index: 7, kind: output, shape index: {0}]   ;;  %s4998_s8 = inlined_call_operand.hbm [shape: f32[8,1,8], index: 8, kind: output, shape index: {1}]  }
   0x1   :  { %15 = vsyncpa [#allocation6], 0 }
   0x2   :  { %16 = vsyncpa [#allocation9], 0 }
   0x3   :  { %17 = vsyncpa [#allocation4], 0  ;;  %s3279_s27 = smov [#allocation5]  }
   0x4   :  { %s35_s28 = sshll.u32 %s3279_s27, 4  ;;  %s36_s28 = int_to_ptr.vmem [resolvable:$true] %s35_s28 }
   0x5   :  { %s3179_s29 = scalar_lea.vmem %s36_s28, 1024  ;;  %p3184_p1 = scmp.lt.s32.totalorder %s36_s28, %s36_s28 }
   0x6   :  { %p3180_p0 = scmp.ne.s32.totalorder %s36_s28, %s3179_s29  ;;  %p3185_p2 = scmp.lt.s32.totalorder %s3179_s29, %s3179_s29 }
   0x8   :  { %p3186_p3 = por %p3185_p2, %p3184_p1 }
   0xa   :  { %p3187_p4 = pnand %p3186_p3, %p3180_p0 }
   0xc   :  { %3190 = shalt.err (!%p3187_p4)
}
   0xd   :  { %s3280_s30 = smov 128   ;;  %s3281_s9 = smov 8  }
   0xe   :  { %41 = dma.hbm_to_vmem [thread:$0]  %s4991_s1, 1024, %s36_s28, [#allocation6], %s3280_s30, %s3280_s30, %s3281_s9  }
   0xf   :  { %s3282_s12 = smov [#allocation2]  }
  0x10   :  { %s23_s13 = sshll.u32 %s3282_s12, 4  ;;  %s24_s13 = int_to_ptr.vmem [resolvable:$true] %s23_s13 }
  0x11   :  { %s3199_s14 = scalar_lea.vmem %s24_s13, 128  ;;  %p3204_p6 = scmp.lt.s32.totalorder %s24_s13, %s24_s13 }
  0x12   :  { %p3200_p5 = scmp.ne.s32.totalorder %s24_s13, %s3199_s14  ;;  %p3205_p7 = scmp.lt.s32.totalorder %s3199_s14, %s3199_s14 }
  0x14   :  { %p3206_p8 = por %p3205_p7, %p3204_p6 }
  0x16   :  { %p3207_p9 = pnand %p3206_p8, %p3200_p5 }
  0x18   :  { %3210 = shalt.err (!%p3207_p9)
}
  0x19   :  { %s3283_s15 = smov 16   ;;  %s3284_s16 = smov 1  }
  0x1a   :  { %29 = dma.hbm_to_vmem [thread:$0]  %s4990_s0, 128, %s24_s13, [#allocation3], %s3283_s15, %s3283_s15, %s3284_s16  }
  0x1b   :  { %s3285_s1 = smov [#allocation7]   ;;  %s3286_s20 = smov [#allocation8]  }
  0x1c   :  { %s47_s19 = sshll.u32 %s3285_s1, 4  ;;  %s61_s21 = sshll.u32 %s3286_s20, 4  ;;  %s48_s19 = int_to_ptr.vmem [resolvable:$true] %s47_s19  ;;  %s62_s21 = int_to_ptr.vmem [resolvable:$true] %s61_s21 }
  0x1d   :  { %s3219_s22 = scalar_lea.vmem %s48_s19, 2048  ;;  %p3224_p11 = scmp.lt.s32.totalorder %s48_s19, %s48_s19 }
  0x1e   :  { %p3220_p10 = scmp.ne.s32.totalorder %s48_s19, %s3219_s22  ;;  %p3225_p12 = scmp.lt.s32.totalorder %s3219_s22, %s3219_s22 }
  0x20   :  { %p3226_p13 = por %p3225_p12, %p3224_p11 }
  0x22   :  { %p3227_p0 = pnand %p3226_p13, %p3220_p10 }
  0x24   :  { %3230 = shalt.err (!%p3227_p0)
}
  0x25   :  { %53 = dma.hbm_to_vmem [thread:$0]  %s4992_s2, 2048, %s48_s19, [#allocation6], %s3280_s30, %s3280_s30, %s3281_s9  }
  0x26   :  { %s3239_s0 = scalar_lea.vmem %s62_s21, 2048  ;;  %p3244_p2 = scmp.lt.s32.totalorder %s62_s21, %s62_s21 }
  0x27   :  { %p3240_p1 = scmp.ne.s32.totalorder %s62_s21, %s3239_s0  ;;  %p3245_p3 = scmp.lt.s32.totalorder %s3239_s0, %s3239_s0 }
  0x29   :  { %p3246_p4 = por %p3245_p3, %p3244_p2 }
  0x2b   :  { %p3247_p5 = pnand %p3246_p4, %p3240_p1 }
  0x2d   :  { %3250 = shalt.err (!%p3247_p5)
}
  0x2e   :  { %67 = dma.hbm_to_vmem [thread:$0]  %s4994_s4, 2048, %s62_s21, [#allocation9], %s3280_s30, %s3280_s30, %s3281_s9  }
  0x2f   :  { %3271 = dma.done.wait [#allocation3], 128  }
  0x30   :  { %3272 = vsyncadd [#allocation3], 4294967168 }
  0x31   :  { %3273 = dma.done.wait [#allocation6], 3072  }
  0x32   :  { %3274 = vsyncadd [#allocation6], 4294964224 }
  0x33   :  { %3275 = dma.done.wait [#allocation9], 2048  }
  0x34   :  { %3276 = vsyncadd [#allocation9], 4294965248  ;;  %v4999_v0 = vmov 0.0   ;;  %vm3288_vm0 = vmmov 0   ;;  %v107_v1 = vld [vmem:[#allocation7 + $0x78] sm:$0xff]  ;;  %v106_v3 = vld [vmem:[#allocation7 + $0x70] sm:$0xff]  ;;  %v130_v9 = vlaneseq }
  0x35   :  { %2494 = vmatprep.subr.mxu0 %v4999_v0  ;;  %2526 = vmatprep.mubr.msk.f32.mxu0 %vm3288_vm0, %v4999_v0  ;;  %v266_v2 = vld [vmem:[#allocation8 + $0x78] sm:$0xff]  ;;  %v265_v4 = vld [vmem:[#allocation8 + $0x70] sm:$0xff]  ;;  %v105_v5 = vld [vmem:[#allocation7 + $0x68] sm:$0xff]  ;;  %v3289_v7 = vmov 1966171168   ;;  %vm444_vm1 = vcmask 64512  }
  0x36   :  { %2495 = vmatpush3.msra.mxu0 %v107_v1  ;;  %2529 = vmatprep.subr.mxu1 %v266_v2  ;;  %v264_v6 = vld [vmem:[#allocation8 + $0x68] sm:$0xff]  ;;  %v128_v8 = vunpack.c.l.s4 %v3289_v7  ;;  %v104_v10 = vld [vmem:[#allocation7 + $0x60] sm:$0xff]  ;;  %v103_v12 = vld [vmem:[#allocation7 + $0x58] sm:$0xff]  ;;  %v131_v15 = vshrl.u32 %v130_v9, 7  ;;  %vm645_vm2 = vcmask 57344  }
  0x37   :  { %2496 = vmatprep.subr.mxu0 %v4999_v0  ;;  %2530 = vmatpush3.msra.mxu1 %v266_v2  ;;  %v263_v11 = vld [vmem:[#allocation8 + $0x60] sm:$0xff]  ;;  %v262_v13 = vld [vmem:[#allocation8 + $0x58] sm:$0xff]  ;;  %v102_v16 = vld [vmem:[#allocation7 + $0x50] sm:$0xff] }
  0x38   :  { %2497 = vmatpush3.msra.mxu0 %v106_v3  ;;  %2531 = vmatprep.subr.mxu1 %v265_v4  ;;  %v129_v14 = vunpack.c.0.s8 %v128_v8  ;;  %v261_v17 = vld [vmem:[#allocation8 + $0x50] sm:$0xff]  ;;  %v101_v18 = vld [vmem:[#allocation7 + $0x48] sm:$0xff]  ;;  %v100_v20 = vld [vmem:[#allocation7 + $0x40] sm:$0xff] }
  0x39   :  { %2498 = vmatprep.subr.mxu0 %v4999_v0  ;;  %2532 = vmatpush3.msra.mxu1 %v265_v4  ;;  %v260_v19 = vld [vmem:[#allocation8 + $0x48] sm:$0xff]  ;;  %v259_v21 = vld [vmem:[#allocation8 + $0x40] sm:$0xff]  ;;  %v84_v22 = vld [vmem:[#allocation2] sm:$0x1] }
  0x3a   :  { %2499 = vmatpush3.msra.mxu0 %v105_v5  ;;  %2533 = vmatprep.subr.mxu1 %v264_v6  ;;  %v85_v23 = vld [vmem:[#allocation2 + $0x1] sm:$0x1]  ;;  %v86_v24 = vld [vmem:[#allocation2 + $0x2] sm:$0x1]  ;;  %v87_v25 = vld [vmem:[#allocation2 + $0x3] sm:$0x1]  ;;  %v132_v26 = vsub.s32 %v129_v14, %v131_v15 }
  0x3b   :  { %2500 = vmatprep.subr.mxu0 %v4999_v0  ;;  %2534 = vmatpush3.msra.mxu1 %v264_v6  ;;  %v88_v27 = vld [vmem:[#allocation2 + $0x4] sm:$0x1]  ;;  %v89_v28 = vld [vmem:[#allocation2 + $0x5] sm:$0x1]  ;;  %v90_v29 = vld [vmem:[#allocation2 + $0x6] sm:$0x1]  ;;  %v123_v30 = vcombine.low %v84_v22, %v85_v23  ;;  %v124_v31 = vcombine.low %v86_v24, %v87_v25 }
  0x3c   :  { %2501 = vmatpush3.msra.mxu0 %v104_v10  ;;  %2535 = vmatprep.subr.mxu1 %v263_v11  ;;  %v91_v32 = vld [vmem:[#allocation2 + $0x7] sm:$0x1]  ;;  %v125_v33 = vcombine.low %v88_v27, %v89_v28  ;;  %v98_v38 = vld [vmem:[#allocation7 + $0x30] sm:$0xff]  ;;  %v97_v43 = vld [vmem:[#allocation7 + $0x28] sm:$0xff] }
  0x3d   :  { %2502 = vmatprep.subr.mxu0 %v4999_v0  ;;  %2536 = vmatpush3.msra.mxu1 %v263_v11  ;;  %v99_v34 = vld [vmem:[#allocation7 + $0x38] sm:$0xff]  ;;  %v126_v36 = vcombine.low %v90_v29, %v91_v32  ;;  %v133_v37 = vrot.slane %v123_v30, %v132_v26  ;;  %v257_v39 = vld [vmem:[#allocation8 + $0x30] sm:$0xff]  ;;  %v140_v40 = vrot.slane %v124_v31, %v132_v26  ;;  %v256_v44 = vld [vmem:[#allocation8 + $0x28] sm:$0xff] }
  0x3e   :  { %2503 = vmatpush3.msra.mxu0 %v103_v12  ;;  %2537 = vmatprep.subr.mxu1 %v262_v13  ;;  %v258_v35 = vld [vmem:[#allocation8 + $0x38] sm:$0xff]  ;;  %v147_v41 = vrot.slane %v125_v33, %v132_v26  ;;  %v96_v45 = vld [vmem:[#allocation7 + $0x20] sm:$0xff]  ;;  %v94_v51 = vld [vmem:[#allocation7 + $0x10] sm:$0xff] }
  0x3f   :  { %2504 = vmatprep.subr.mxu0 %v4999_v0  ;;  %2538 = vmatpush3.msra.mxu1 %v262_v13  ;;  %v154_v42 = vrot.slane %v126_v36, %v132_v26  ;;  %v255_v46 = vld [vmem:[#allocation8 + $0x20] sm:$0xff]  ;;  %v155_v47 = vcombine.low %v133_v37, %v140_v40  ;;  %v95_v49 = vld [vmem:[#allocation7 + $0x18] sm:$0xff]  ;;  %v253_v52 = vld [vmem:[#allocation8 + $0x10] sm:$0xff] }
  0x40   :  { %2505 = vmatpush3.msra.mxu0 %v102_v16  ;;  %2539 = vmatprep.subr.mxu1 %v261_v17  ;;  %v254_v50 = vld [vmem:[#allocation8 + $0x18] sm:$0xff]  ;;  %v93_v55 = vld [vmem:[#allocation7 + $0x8] sm:$0xff]  ;;  %v92_v57 = vld [vmem:[#allocation7] sm:$0xff] }
  0x41   :  { %2506 = vmatprep.subr.mxu0 %v4999_v0  ;;  %2540 = vmatpush3.msra.mxu1 %v261_v17  ;;  %v156_v48 = vcombine.low %v147_v41, %v154_v42  ;;  %v163_v53 = vrot.slane %v155_v47, %v132_v26  ;;  %v252_v56 = vld [vmem:[#allocation8 + $0x8] sm:$0xff]  ;;  %v251_v58 = vld [vmem:[#allocation8] sm:$0xff]  ;;  %v245_v62 = vld [vmem:[#allocation5 + $0x10] sm:$0xff] }
  0x42   :  { %2507 = vmatpush3.msra.mxu0 %v101_v18  ;;  %2541 = vmatprep.subr.mxu1 %v260_v19  ;;  %v243_v60 = vld [vmem:[#allocation5] sm:$0xff]  ;;  %v244_v61 = vld [vmem:[#allocation5 + $0x8] sm:$0xff]  ;;  %v246_v63 = vld [vmem:[#allocation5 + $0x18] sm:$0xff] }
  0x43   :  { %2508 = vmatprep.subr.mxu0 %v4999_v0  ;;  %2542 = vmatpush3.msra.mxu1 %v260_v19  ;;  %v170_v54 = vrot.slane %v156_v48, %v132_v26  ;;  %v247_v1 = vld [vmem:[#allocation5 + $0x20] sm:$0xff]  ;;  %v248_v2 = vld [vmem:[#allocation5 + $0x28] sm:$0xff]  ;;  %v249_v3 = vld [vmem:[#allocation5 + $0x30] sm:$0xff] }
  0x44   :  { %2509 = vmatpush3.msra.mxu0 %v100_v20  ;;  %2543 = vmatprep.subr.mxu1 %v259_v21  ;;  %v250_v4 = vld [vmem:[#allocation5 + $0x38] sm:$0xff] }
  0x45   :  { %2510 = vmatprep.subr.mxu0 %v4999_v0  ;;  %2544 = vmatpush3.msra.mxu1 %v259_v21  ;;  %v171_v59 = vcombine.low %v163_v53, %v170_v54  ;;  %v2203_v5 = vld [vmem:[%s4993_s3] ss:$0 sm:$0xff] }
  0x46   :  { %2511 = vmatpush3.msra.mxu0 %v99_v34  ;;  %2545 = vmatprep.subr.mxu1 %v258_v35  ;;  %v3398_v7 = vld [vmem:[%s4995_s5] ss:$0 sm:$0xff] }
  0x47   :  { %2512 = vmatprep.subr.mxu0 %v4999_v0  ;;  %2546 = vmatpush3.msra.mxu1 %v258_v35 }
  0x48   :  { %2513 = vmatpush3.msra.mxu0 %v98_v38  ;;  %2547 = vmatprep.subr.mxu1 %v257_v39 }
  0x49   :  { %2514 = vmatprep.subr.mxu0 %v4999_v0  ;;  %2548 = vmatpush3.msra.mxu1 %v257_v39 }
  0x4a   :  { %2515 = vmatpush3.msra.mxu0 %v97_v43  ;;  %2549 = vmatprep.subr.mxu1 %v256_v44 }
  0x4b   :  { %2516 = vmatprep.subr.mxu0 %v4999_v0  ;;  %2550 = vmatpush3.msra.mxu1 %v256_v44 }
  0x4c   :  { %2517 = vmatpush3.msra.mxu0 %v96_v45  ;;  %2551 = vmatprep.subr.mxu1 %v255_v46 }
  0x4d   :  { %2518 = vmatprep.subr.mxu0 %v4999_v0  ;;  %2552 = vmatpush3.msra.mxu1 %v255_v46 }
  0x4e   :  { %2519 = vmatpush3.msra.mxu0 %v95_v49  ;;  %2553 = vmatprep.subr.mxu1 %v254_v50 }
  0x4f   :  { %2520 = vmatprep.subr.mxu0 %v4999_v0  ;;  %2554 = vmatpush3.msra.mxu1 %v254_v50 }
  0x50   :  { %2521 = vmatpush3.msra.mxu0 %v94_v51  ;;  %2555 = vmatprep.subr.mxu1 %v253_v52 }
  0x51   :  { %2522 = vmatprep.subr.mxu0 %v4999_v0  ;;  %2556 = vmatpush3.msra.mxu1 %v253_v52 }
  0x52   :  { %2523 = vmatpush3.msra.mxu0 %v93_v55  ;;  %2557 = vmatprep.subr.mxu1 %v252_v56 }
  0x53   :  { %2524 = vmatprep.subr.mxu0 %v4999_v0  ;;  %2558 = vmatpush3.msra.mxu1 %v252_v56 }
  0x54   :  { %2525 = vmatpush3.msra.mxu0 %v92_v57  ;;  %2559 = vmatprep.subr.mxu1 %v251_v58 }
  0x55   :  { %2527 = vmatmul.mubr.f32.vlgmr.msra.gmra.mxu0 %v171_v59  ;;  %2560 = vmatpush3.msra.mxu1 %v251_v58 }
  0x56   :  { %2561 = vmatprep.mubr.f32.mxu1 %v243_v60  ;;  %2573 = vmatprep.subr.mxu0 %v4999_v0 }
  0x57   :  { %2562 = vmatmul.mubr.f32.vlgmr.msra.gmra.mxu1 %v244_v61  ;;  %2608 = vmatprep.subr.mxu1 %v4999_v0 }
  0x58   :  { %2564 = vmatprep.mubr.f32.mxu1 %v245_v62  ;;  %2605 = vmatprep.mubr.msk.f32.mxu0 %vm3288_vm0, %v4999_v0 }
  0x5b   :  { %2565 = vmatmul.mubr.f32.gmra.mxu1 %v246_v63 }
  0x5c   :  { %2567 = vmatprep.mubr.f32.mxu1 %v247_v1 }
  0x5f   :  { %2568 = vmatmul.mubr.f32.gmra.mxu1 %v248_v2 }
  0x60   :  { %2570 = vmatprep.mubr.f32.mxu1 %v249_v3 }
  0x63   :  { %2571 = vmatmul.mubr.f32.gmra.mxu1 %v250_v4 }
  0x64   :  { %2640 = vmatprep.mubr.msk.f32.mxu1 %vm3288_vm0, %v4999_v0 }
 0x115   :  { %v239_v6 = vpop.f32.mrf.mxu0 }
 0x116   :  { %v240_v8 = vadd.f32 %v2203_v5, %v239_v6 }
 0x117   :  { %v2563_v9 = vpop.f32.mrf.mxu1  ;;  %v2528_v10 = vpop.f32.mrf.mxu0 }
 0x118   :  { %379 = vxpose.xlu0.b32.start.end [1/1] (short) %v240_v8, 128  ;;  %v346_v11 = vadd.f32 %v2563_v9, %v3398_v7  ;;  %v5001_v9 = vmov 0  }
 0x119   :  { %v340_v12 = vpop.f32.mrf.mxu1 }
 0x11a   :  { %647 = vxpose.xlu1.b32.start.end [1/1] (short) %v346_v11, 128  ;;  %v341_v15 = vadd.f32 %v3398_v7, %v340_v12 }
 0x11b   :  { %v2566_v13 = vpop.f32.mrf.mxu1 }
 0x11c   :  { %v356_v19 = vadd.f32 %v2566_v13, %v3398_v7 }
 0x11d   :  { %v350_v14 = vpop.f32.mrf.mxu1 }
 0x11e   :  { %v351_v16 = vadd.f32 %v3398_v7, %v350_v14 }
 0x11f   :  { %v2569_v17 = vpop.f32.mrf.mxu1 }
 0x120   :  { %v366_v52 = vadd.f32 %v2569_v17, %v3398_v7 }
 0x121   :  { %v360_v18 = vpop.f32.mrf.mxu1 }
 0x122   :  { %v361_v20 = vadd.f32 %v3398_v7, %v360_v18 }
 0x123   :  { %v3517_v47 = vpop.f32.mrf.mxu1 }
 0x125   :  { %v370_v50 = vpop.f32.mrf.mxu1 }
 0x126   :  { %v371_v53 = vadd.f32 %v3398_v7, %v370_v50 }
 0x155   :  { %412 = vxpose.xlu0.b32.start.end [1/1] (short) %v341_v15, 128 }
 0x157   :  { %866 = vxpose.xlu1.b32.start.end [1/1] (short) %v351_v16, 128 }
 0x192   :  { %1085 = vxpose.xlu0.b32.start.end [1/1] (short) %v356_v19, 128 }
 0x194   :  { %1304 = vxpose.xlu1.b32.start.end [1/1] (short) %v361_v20, 128  ;;  %v3405_v21 = vpop.trf.xlu0 }
 0x196   :  { %v3407_v22 = vpop.trf.xlu1 }
 0x197   :  { %5116 = vst [vmem:[#allocation15_spill] sm:$0xff] %v3407_v22  ;;  %2205 = vst.msk [vmem:[%s4997_s7 + $0x80] sm:$0xff] %vm444_vm1, %v3407_v22  ;;  %v5225_v22 = vmov 3  }
 0x198   :  { %v3414_v23 = vpop.trf.xlu0 }
 0x19a   :  { %v3416_v24 = vpop.trf.xlu1 }
 0x19b   :  { %5117 = vst [vmem:[#allocation16_spill] sm:$0xff] %v3416_v24  ;;  %2206 = vst.msk [vmem:[%s4997_s7 + $0x88] sm:$0xff] %vm444_vm1, %v3416_v24 }
 0x19c   :  { %v3423_v25 = vpop.trf.xlu0 }
 0x19e   :  { %v3425_v26 = vpop.trf.xlu1 }
 0x19f   :  { %5118 = vst [vmem:[#allocation17_spill] sm:$0xff] %v3425_v26  ;;  %2207 = vst.msk [vmem:[%s4997_s7 + $0x90] sm:$0xff] %vm444_vm1, %v3425_v26 }
 0x1a0   :  { %v3432_v27 = vpop.trf.xlu0 }
 0x1a2   :  { %v3434_v28 = vpop.trf.xlu1 }
 0x1a3   :  { %5119 = vst [vmem:[#allocation18_spill] sm:$0xff] %v3434_v28  ;;  %2208 = vst.msk [vmem:[%s4997_s7 + $0x98] sm:$0xff] %vm444_vm1, %v3434_v28 }
 0x1a4   :  { %v3441_v29 = vpop.trf.xlu0 }
 0x1a5   :  { %5120 = vst [vmem:[#allocation19_spill] sm:$0xff] %v3441_v29 }
 0x1a6   :  { %v3443_v30 = vpop.trf.xlu1 }
 0x1a7   :  { %5121 = vst [vmem:[#allocation20_spill] sm:$0xff] %v3443_v30  ;;  %2209 = vst.msk [vmem:[%s4997_s7 + $0xa0] sm:$0xff] %vm444_vm1, %v3443_v30 }
 0x1a8   :  { %v3450_v31 = vpop.trf.xlu0 }
 0x1a9   :  { %5122 = vst [vmem:[#allocation21_spill] sm:$0xff] %v3450_v31 }
 0x1aa   :  { %v3452_v32 = vpop.trf.xlu1 }
 0x1ab   :  { %5123 = vst [vmem:[#allocation22_spill] sm:$0xff] %v3452_v32  ;;  %2210 = vst.msk [vmem:[%s4997_s7 + $0xa8] sm:$0xff] %vm444_vm1, %v3452_v32 }
 0x1ac   :  { %v3459_v33 = vpop.trf.xlu0 }
 0x1ae   :  { %v3461_v34 = vpop.trf.xlu1 }
 0x1af   :  { %5124 = vst [vmem:[#allocation23_spill] sm:$0xff] %v3461_v34  ;;  %2211 = vst.msk [vmem:[%s4997_s7 + $0xb0] sm:$0xff] %vm444_vm1, %v3461_v34 }
 0x1b0   :  { %v3468_v35 = vpop.trf.xlu0 }
 0x1b2   :  { %v3470_v36 = vpop.trf.xlu1 }
 0x1b3   :  { %2212 = vst.msk [vmem:[%s4997_s7 + $0xb8] sm:$0xff] %vm444_vm1, %v3470_v36 }
 0x1b4   :  { %v3477_v37 = vpop.trf.xlu0 }
 0x1b5   :  { %5125 = vst [vmem:[#allocation24_spill] sm:$0xff] %v3477_v37 }
 0x1b6   :  { %v3479_v38 = vpop.trf.xlu1 }
 0x1b7   :  { %2213 = vst.msk [vmem:[%s4997_s7 + $0xc0] sm:$0xff] %vm444_vm1, %v3479_v38 }
 0x1b8   :  { %v3486_v39 = vpop.trf.xlu0 }
 0x1ba   :  { %v3488_v40 = vpop.trf.xlu1 }
 0x1bb   :  { %2214 = vst.msk [vmem:[%s4997_s7 + $0xc8] sm:$0xff] %vm444_vm1, %v3488_v40 }
 0x1bc   :  { %v3495_v41 = vpop.trf.xlu0 }
 0x1be   :  { %v3497_v42 = vpop.trf.xlu1 }
 0x1bf   :  { %2215 = vst.msk [vmem:[%s4997_s7 + $0xd0] sm:$0xff] %vm444_vm1, %v3497_v42 }
 0x1c0   :  { %v3504_v43 = vpop.trf.xlu0 }
 0x1c2   :  { %v3506_v44 = vpop.trf.xlu1 }
 0x1c3   :  { %2216 = vst.msk [vmem:[%s4997_s7 + $0xd8] sm:$0xff] %vm444_vm1, %v3506_v44 }
 0x1c4   :  { %v3513_v45 = vpop.trf.xlu0 }
 0x1c6   :  { %v3515_v46 = vpop.trf.xlu1 }
 0x1c7   :  { %2217 = vst.msk [vmem:[%s4997_s7 + $0xe0] sm:$0xff] %vm444_vm1, %v3515_v46 }
 0x1c8   :  { %v3524_v48 = vpop.trf.xlu0 }
 0x1ca   :  { %v3526_v49 = vpop.trf.xlu1 }
 0x1cb   :  { %2218 = vst.msk [vmem:[%s4997_s7 + $0xe8] sm:$0xff] %vm444_vm1, %v3526_v49 }
 0x1cc   :  { %v3533_v51 = vpop.trf.xlu0 }
 0x1ce   :  { %v3537_v54 = vpop.trf.xlu1 }
 0x1cf   :  { %1523 = vxpose.xlu0.b32.start.end [1/1] (short) %v366_v52, 128  ;;  %2219 = vst.msk [vmem:[%s4997_s7 + $0xf0] sm:$0xff] %vm444_vm1, %v3537_v54 }
 0x1d0   :  { %v3544_v55 = vpop.trf.xlu0 }
 0x1d1   :  { %1742 = vxpose.xlu1.b32.start.end [1/1] (short) %v371_v53, 128  ;;  %v376_v53 = vadd.f32 %v3517_v47, %v3398_v7 }
 0x1d2   :  { %v3546_v56 = vpop.trf.xlu1 }
 0x1d3   :  { %2220 = vst.msk [vmem:[%s4997_s7 + $0xf8] sm:$0xff] %vm444_vm1, %v3546_v56 }
 0x1d4   :  { %v3553_v57 = vpop.trf.xlu0 }
 0x1d5   :  { %445 = vst.msk [vmem:[%s4997_s7] sm:$0xff] %vm444_vm1, %v3553_v57 }
 0x1d6   :  { %v3560_v58 = vpop.trf.xlu1 }
 0x1d7   :  { %5126 = vst [vmem:[#allocation25_spill] sm:$0xff] %v3560_v58  ;;  %2221 = vst.msk [vmem:[%s4997_s7 + $0x100] sm:$0xff] %vm444_vm1, %v3560_v58 }
 0x1d8   :  { %v3567_v59 = vpop.trf.xlu0 }
 0x1d9   :  { %446 = vst.msk [vmem:[%s4997_s7 + $0x8] sm:$0xff] %vm444_vm1, %v3567_v59 }
 0x1da   :  { %v3574_v60 = vpop.trf.xlu1 }
 0x1db   :  { %5127 = vst [vmem:[#allocation26_spill] sm:$0xff] %v3574_v60  ;;  %2222 = vst.msk [vmem:[%s4997_s7 + $0x108] sm:$0xff] %vm444_vm1, %v3574_v60 }
 0x1dc   :  { %v3581_v61 = vpop.trf.xlu0 }
 0x1dd   :  { %447 = vst.msk [vmem:[%s4997_s7 + $0x10] sm:$0xff] %vm444_vm1, %v3581_v61 }
 0x1de   :  { %v3588_v62 = vpop.trf.xlu1 }
 0x1df   :  { %5128 = vst [vmem:[#allocation27_spill] sm:$0xff] %v3588_v62  ;;  %2223 = vst.msk [vmem:[%s4997_s7 + $0x110] sm:$0xff] %vm444_vm1, %v3588_v62 }
 0x1e0   :  { %v3595_v63 = vpop.trf.xlu0 }
 0x1e1   :  { %448 = vst.msk [vmem:[%s4997_s7 + $0x18] sm:$0xff] %vm444_vm1, %v3595_v63 }
 0x1e2   :  { %v3602_v1 = vpop.trf.xlu1 }
 0x1e3   :  { %5129 = vst [vmem:[#allocation28_spill] sm:$0xff] %v3602_v1  ;;  %2224 = vst.msk [vmem:[%s4997_s7 + $0x118] sm:$0xff] %vm444_vm1, %v3602_v1 }
 0x1e4   :  { %v3609_v2 = vpop.trf.xlu0 }
 0x1e5   :  { %449 = vst.msk [vmem:[%s4997_s7 + $0x20] sm:$0xff] %vm444_vm1, %v3609_v2 }
 0x1e6   :  { %v3616_v3 = vpop.trf.xlu1 }
 0x1e7   :  { %5130 = vst [vmem:[#allocation29_spill] sm:$0xff] %v3616_v3  ;;  %2225 = vst.msk [vmem:[%s4997_s7 + $0x120] sm:$0xff] %vm444_vm1, %v3616_v3 }
 0x1e8   :  { %v3623_v4 = vpop.trf.xlu0 }
 0x1e9   :  { %450 = vst.msk [vmem:[%s4997_s7 + $0x28] sm:$0xff] %vm444_vm1, %v3623_v4 }
 0x1ea   :  { %v3630_v5 = vpop.trf.xlu1 }
 0x1eb   :  { %5131 = vst [vmem:[#allocation30_spill] sm:$0xff] %v3630_v5  ;;  %2226 = vst.msk [vmem:[%s4997_s7 + $0x128] sm:$0xff] %vm444_vm1, %v3630_v5 }
 0x1ec   :  { %v3637_v6 = vpop.trf.xlu0 }
 0x1ed   :  { %451 = vst.msk [vmem:[%s4997_s7 + $0x30] sm:$0xff] %vm444_vm1, %v3637_v6 }
 0x1ee   :  { %v3644_v8 = vpop.trf.xlu1 }
 0x1ef   :  { %5132 = vst [vmem:[#allocation31_spill] sm:$0xff] %v3644_v8  ;;  %2227 = vst.msk [vmem:[%s4997_s7 + $0x130] sm:$0xff] %vm444_vm1, %v3644_v8  ;;  %2873 = vset.pattern.permute.xlu1 %v5001_v9 }
 0x1f0   :  { %v3652_v10 = vpop.trf.xlu0 }
 0x1f1   :  { %452 = vst.msk [vmem:[%s4997_s7 + $0x38] sm:$0xff] %vm444_vm1, %v3652_v10 }
 0x1f2   :  { %v3659_v11 = vpop.trf.xlu1 }
 0x1f3   :  { %5133 = vst [vmem:[#allocation32_spill] sm:$0xff] %v3659_v11  ;;  %2228 = vst.msk [vmem:[%s4997_s7 + $0x138] sm:$0xff] %vm444_vm1, %v3659_v11 }
 0x1f4   :  { %v3666_v12 = vpop.trf.xlu0 }
 0x1f5   :  { %453 = vst.msk [vmem:[%s4997_s7 + $0x40] sm:$0xff] %vm444_vm1, %v3666_v12 }
 0x1f6   :  { %v3673_v13 = vpop.trf.xlu1 }
 0x1f7   :  { %5134 = vst [vmem:[#allocation33_spill] sm:$0xff] %v3673_v13  ;;  %2229 = vst.msk [vmem:[%s4997_s7 + $0x140] sm:$0xff] %vm444_vm1, %v3673_v13 }
 0x1f8   :  { %v3680_v14 = vpop.trf.xlu0 }
 0x1f9   :  { %454 = vst.msk [vmem:[%s4997_s7 + $0x48] sm:$0xff] %vm444_vm1, %v3680_v14 }
 0x1fa   :  { %v3687_v15 = vpop.trf.xlu1 }
 0x1fb   :  { %5135 = vst [vmem:[#allocation34_spill] sm:$0xff] %v3687_v15  ;;  %2230 = vst.msk [vmem:[%s4997_s7 + $0x148] sm:$0xff] %vm444_vm1, %v3687_v15 }
 0x1fc   :  { %v3694_v16 = vpop.trf.xlu0 }
 0x1fd   :  { %455 = vst.msk [vmem:[%s4997_s7 + $0x50] sm:$0xff] %vm444_vm1, %v3694_v16 }
 0x1fe   :  { %v3701_v17 = vpop.trf.xlu1 }
 0x1ff   :  { %5136 = vst [vmem:[#allocation35_spill] sm:$0xff] %v3701_v17  ;;  %2231 = vst.msk [vmem:[%s4997_s7 + $0x150] sm:$0xff] %vm444_vm1, %v3701_v17 }
 0x200   :  { %v3708_v18 = vpop.trf.xlu0 }
 0x201   :  { %456 = vst.msk [vmem:[%s4997_s7 + $0x58] sm:$0xff] %vm444_vm1, %v3708_v18 }
 0x202   :  { %v3715_v19 = vpop.trf.xlu1 }
 0x203   :  { %5137 = vst [vmem:[#allocation36_spill] sm:$0xff] %v3715_v19  ;;  %2232 = vst.msk [vmem:[%s4997_s7 + $0x158] sm:$0xff] %vm444_vm1, %v3715_v19  ;;  %v5024_v19 = vmov 1  }
 0x204   :  { %v3722_v20 = vpop.trf.xlu0 }
 0x205   :  { %457 = vst.msk [vmem:[%s4997_s7 + $0x60] sm:$0xff] %vm444_vm1, %v3722_v20 }
 0x206   :  { %v3729_v50 = vpop.trf.xlu1 }
 0x207   :  { %5138 = vst [vmem:[#allocation37_spill] sm:$0xff] %v3729_v50  ;;  %2233 = vst.msk [vmem:[%s4997_s7 + $0x160] sm:$0xff] %vm444_vm1, %v3729_v50 }
 0x208   :  { %v3736_v52 = vpop.trf.xlu0 }
 0x209   :  { %458 = vst.msk [vmem:[%s4997_s7 + $0x68] sm:$0xff] %vm444_vm1, %v3736_v52 }
 0x20a   :  { %v3745_v0 = vpop.trf.xlu1 }
 0x20b   :  { %5139 = vst [vmem:[#allocation38_spill] sm:$0xff] %v3745_v0  ;;  %2234 = vst.msk [vmem:[%s4997_s7 + $0x168] sm:$0xff] %vm444_vm1, %v3745_v0 }
 0x20c   :  { %v3752_v9 = vpop.trf.xlu0  ;;  %1961 = vxpose.xlu0.b32.start.end [1/1] (short) %v376_v53, 128 }
 0x20d   :  { %459 = vst.msk [vmem:[%s4997_s7 + $0x70] sm:$0xff] %vm444_vm1, %v3752_v9 }
 0x20e   :  { %v3759_v58 = vpop.trf.xlu1 }
 0x20f   :  { %5140 = vst [vmem:[#allocation39_spill] sm:$0xff] %v3759_v58  ;;  %2235 = vst.msk [vmem:[%s4997_s7 + $0x170] sm:$0xff] %vm444_vm1, %v3759_v58 }
 0x210   :  { %v3766_v7 = vpop.trf.xlu0 }
 0x211   :  { %460 = vst.msk [vmem:[%s4997_s7 + $0x78] sm:$0xff] %vm444_vm1, %v3766_v7 }
 0x212   :  { %v3773_v47 = vpop.trf.xlu1 }
 0x213   :  { %5141 = vst [vmem:[#allocation40_spill] sm:$0xff] %v3773_v47  ;;  %2236 = vst.msk [vmem:[%s4997_s7 + $0x178] sm:$0xff] %vm444_vm1, %v3773_v47 }
 0x214   :  { %v3780_v53 = vpop.trf.xlu0 }
 0x215   :  { %5142 = vst [vmem:[#allocation41_spill] sm:$0xff] %v3780_v53  ;;  %2237 = vst.msk [vmem:[%s4997_s7 + $0x180] sm:$0xff] %vm444_vm1, %v3780_v53 }
 0x216   :  { %v3787_v62 = vpop.trf.xlu1 }
 0x217   :  { %5143 = vst [vmem:[#allocation42_spill] sm:$0xff] %v3787_v62  ;;  %2253 = vst.msk [vmem:[%s4997_s7 + $0x200] sm:$0xff] %vm444_vm1, %v3787_v62 }
 0x218   :  { %v3794_v1 = vpop.trf.xlu0 }
 0x219   :  { %5144 = vst [vmem:[#allocation43_spill] sm:$0xff] %v3794_v1  ;;  %2238 = vst.msk [vmem:[%s4997_s7 + $0x188] sm:$0xff] %vm444_vm1, %v3794_v1 }
 0x21a   :  { %v3801_v3 = vpop.trf.xlu1 }
 0x21b   :  { %5145 = vst [vmem:[#allocation44_spill] sm:$0xff] %v3801_v3  ;;  %2254 = vst.msk [vmem:[%s4997_s7 + $0x208] sm:$0xff] %vm444_vm1, %v3801_v3 }
 0x21c   :  { %v3808_v5 = vpop.trf.xlu0 }
 0x21d   :  { %5146 = vst [vmem:[#allocation45_spill] sm:$0xff] %v3808_v5  ;;  %2239 = vst.msk [vmem:[%s4997_s7 + $0x190] sm:$0xff] %vm444_vm1, %v3808_v5 }
 0x21e   :  { %v3815_v62 = vpop.trf.xlu1 }
 0x21f   :  { %5147 = vst [vmem:[#allocation46_spill] sm:$0xff] %v3815_v62  ;;  %2255 = vst.msk [vmem:[%s4997_s7 + $0x210] sm:$0xff] %vm444_vm1, %v3815_v62 }
 0x220   :  { %v3822_v8 = vpop.trf.xlu0 }
 0x221   :  { %5148 = vst [vmem:[#allocation47_spill] sm:$0xff] %v3822_v8  ;;  %2240 = vst.msk [vmem:[%s4997_s7 + $0x198] sm:$0xff] %vm444_vm1, %v3822_v8 }
 0x222   :  { %v3829_v3 = vpop.trf.xlu1 }
 0x223   :  { %5149 = vst [vmem:[#allocation48_spill] sm:$0xff] %v3829_v3  ;;  %2256 = vst.msk [vmem:[%s4997_s7 + $0x218] sm:$0xff] %vm444_vm1, %v3829_v3 }
 0x224   :  { %v3836_v11 = vpop.trf.xlu0 }
 0x225   :  { %5150 = vst [vmem:[#allocation49_spill] sm:$0xff] %v3836_v11  ;;  %2241 = vst.msk [vmem:[%s4997_s7 + $0x1a0] sm:$0xff] %vm444_vm1, %v3836_v11 }
 0x226   :  { %v3843_v62 = vpop.trf.xlu1 }
 0x227   :  { %5151 = vst [vmem:[#allocation50_spill] sm:$0xff] %v3843_v62  ;;  %2257 = vst.msk [vmem:[%s4997_s7 + $0x220] sm:$0xff] %vm444_vm1, %v3843_v62 }
 0x228   :  { %v3850_v13 = vpop.trf.xlu0 }
 0x229   :  { %5152 = vst [vmem:[#allocation51_spill] sm:$0xff] %v3850_v13  ;;  %2242 = vst.msk [vmem:[%s4997_s7 + $0x1a8] sm:$0xff] %vm444_vm1, %v3850_v13 }
 0x22a   :  { %v3857_v3 = vpop.trf.xlu1 }
 0x22b   :  { %5153 = vst [vmem:[#allocation52_spill] sm:$0xff] %v3857_v3  ;;  %463 = vperm.xlu1 %2873, %v3405_v21   ;;  %2258 = vst.msk [vmem:[%s4997_s7 + $0x228] sm:$0xff] %vm444_vm1, %v3857_v3 }
 0x22c   :  { %v3865_v60 = vpop.trf.xlu0 }
 0x22d   :  { %5154 = vst [vmem:[#allocation53_spill] sm:$0xff] %v3865_v60  ;;  %2243 = vst.msk [vmem:[%s4997_s7 + $0x1b0] sm:$0xff] %vm444_vm1, %v3865_v60 }
 0x22e   :  { %v3872_v62 = vpop.trf.xlu1 }
 0x22f   :  { %5155 = vst [vmem:[#allocation54_spill] sm:$0xff] %v3872_v62  ;;  %468 = vperm.xlu1 %2873, %v3414_v23   ;;  %2259 = vst.msk [vmem:[%s4997_s7 + $0x230] sm:$0xff] %vm444_vm1, %v3872_v62 }
 0x230   :  { %v3880_v17 = vpop.trf.xlu0 }
 0x231   :  { %5156 = vst [vmem:[#allocation55_spill] sm:$0xff] %v3880_v17  ;;  %2244 = vst.msk [vmem:[%s4997_s7 + $0x1b8] sm:$0xff] %vm444_vm1, %v3880_v17 }
 0x232   :  { %v3887_v3 = vpop.trf.xlu1 }
 0x233   :  { %5157 = vst [vmem:[#allocation56_spill] sm:$0xff] %v3887_v3  ;;  %2874 = vset.pattern.permute.xlu1 %v5024_v19  ;;  %2260 = vst.msk [vmem:[%s4997_s7 + $0x238] sm:$0xff] %vm444_vm1, %v3887_v3  ;;  %v5160_v3 = vmov 0  }
 0x234   :  { %701 = vperm.xlu1 %2874, %v3414_v23   ;;  %v3896_v62 = vpop.trf.xlu0 }
 0x235   :  { %5158 = vst [vmem:[#allocation57_spill] sm:$0xff] %v3896_v62  ;;  %2245 = vst.msk [vmem:[%s4997_s7 + $0x1c0] sm:$0xff] %vm444_vm1, %v3896_v62  ;;  %2886 = vset.pattern.permute.xlu0 %v5024_v19 }
 0x236   :  { %v3904_v53 = vpop.trf.xlu1 }
 0x237   :  { %5159 = vst [vmem:[#allocation58_spill] sm:$0xff] %v3904_v53  ;;  %2261 = vst.msk [vmem:[%s4997_s7 + $0x240] sm:$0xff] %vm444_vm1, %v3904_v53 }
 0x238   :  { %2875 = vset.pattern.permute.xlu1 %v5160_v3  ;;  %v3912_v15 = vpop.trf.xlu0 }
 0x239   :  { %5161 = vst [vmem:[#allocation59_spill] sm:$0xff] %v3912_v15  ;;  %473 = vperm.xlu1 %2875, %v3423_v25   ;;  %2246 = vst.msk [vmem:[%s4997_s7 + $0x1c8] sm:$0xff] %vm444_vm1, %v3912_v15 }
 0x23a   :  { %v3920_v19 = vpop.trf.xlu1 }
 0x23b   :  { %5162 = vst [vmem:[#allocation60_spill] sm:$0xff] %v3920_v19  ;;  %2262 = vst.msk [vmem:[%s4997_s7 + $0x248] sm:$0xff] %vm444_vm1, %v3920_v19 }
 0x23c   :  { %v3927_v53 = vpop.trf.xlu0 }
 0x23d   :  { %5163 = vst [vmem:[#allocation61_spill] sm:$0xff] %v3927_v53  ;;  %478 = vperm.xlu1 %2875, %v3432_v27   ;;  %2247 = vst.msk [vmem:[%s4997_s7 + $0x1d0] sm:$0xff] %vm444_vm1, %v3927_v53 }
 0x23e   :  { %v3935_v50 = vpop.trf.xlu1 }
 0x23f   :  { %5164 = vst [vmem:[#allocation62_spill] sm:$0xff] %v3935_v50  ;;  %2263 = vst.msk [vmem:[%s4997_s7 + $0x250] sm:$0xff] %vm444_vm1, %v3935_v50 }
 0x240   :  { %v3942_v0 = vpop.trf.xlu0 }
 0x241   :  { %5165 = vst [vmem:[#allocation63_spill] sm:$0xff] %v3942_v0  ;;  %483 = vperm.xlu1 %2875, %v3441_v29   ;;  %2248 = vst.msk [vmem:[%s4997_s7 + $0x1d8] sm:$0xff] %vm444_vm1, %v3942_v0 }
 0x242   :  { %v3950_v19 = vpop.trf.xlu1 }
 0x243   :  { %5166 = vst [vmem:[#allocation64_spill] sm:$0xff] %v3950_v19  ;;  %2264 = vst.msk [vmem:[%s4997_s7 + $0x258] sm:$0xff] %vm444_vm1, %v3950_v19 }
 0x244   :  { %v3957_v1 = vpop.trf.xlu0 }
 0x245   :  { %5167 = vst [vmem:[#allocation65_spill] sm:$0xff] %v3957_v1  ;;  %488 = vperm.xlu1 %2875, %v3450_v31   ;;  %2249 = vst.msk [vmem:[%s4997_s7 + $0x1e0] sm:$0xff] %vm444_vm1, %v3957_v1  ;;  %v5098_v1 = vmov 5  }
 0x246   :  { %v3965_v50 = vpop.trf.xlu1 }
 0x247   :  { %5168 = vst [vmem:[#allocation66_spill] sm:$0xff] %v3965_v50  ;;  %2265 = vst.msk [vmem:[%s4997_s7 + $0x260] sm:$0xff] %vm444_vm1, %v3965_v50 }
 0x248   :  { %v3972_v47 = vpop.trf.xlu0 }
 0x249   :  { %5169 = vst [vmem:[#allocation67_spill] sm:$0xff] %v3972_v47  ;;  %493 = vperm.xlu1 %2875, %v3459_v33   ;;  %2250 = vst.msk [vmem:[%s4997_s7 + $0x1e8] sm:$0xff] %vm444_vm1, %v3972_v47 }
 0x24a   :  { %v3980_v19 = vpop.trf.xlu1 }
 0x24b   :  { %5170 = vst [vmem:[#allocation68_spill] sm:$0xff] %v3980_v19  ;;  %2266 = vst.msk [vmem:[%s4997_s7 + $0x268] sm:$0xff] %vm444_vm1, %v3980_v19 }
 0x24c   :  { %v3987_v58 = vpop.trf.xlu0 }
 0x24d   :  { %5171 = vst [vmem:[#allocation69_spill] sm:$0xff] %v3987_v58  ;;  %498 = vperm.xlu1 %2875, %v3468_v35   ;;  %2251 = vst.msk [vmem:[%s4997_s7 + $0x1f0] sm:$0xff] %vm444_vm1, %v3987_v58 }
 0x24e   :  { %v3995_v50 = vpop.trf.xlu1 }
 0x24f   :  { %5172 = vst [vmem:[#allocation70_spill] sm:$0xff] %v3995_v50  ;;  %2267 = vst.msk [vmem:[%s4997_s7 + $0x270] sm:$0xff] %vm444_vm1, %v3995_v50 }
 0x250   :  { %v4002_v5 = vpop.trf.xlu0 }
 0x251   :  { %5173 = vst [vmem:[#allocation71_spill] sm:$0xff] %v4002_v5  ;;  %503 = vperm.xlu1 %2875, %v3477_v37   ;;  %2252 = vst.msk [vmem:[%s4997_s7 + $0x1f8] sm:$0xff] %vm444_vm1, %v4002_v5 }
 0x252   :  { %v4010_v19 = vpop.trf.xlu1 }
 0x253   :  { %5174 = vst [vmem:[#allocation72_spill] sm:$0xff] %v4010_v19  ;;  %2268 = vst.msk [vmem:[%s4997_s7 + $0x278] sm:$0xff] %vm444_vm1, %v4010_v19 }
 0x254   :  { %v4017_v8 = vpop.trf.xlu0 }
 0x255   :  { %5175 = vst [vmem:[#allocation73_spill] sm:$0xff] %v4017_v8  ;;  %508 = vperm.xlu1 %2875, %v3486_v39   ;;  %2269 = vst.msk [vmem:[%s4997_s7 + $0x280] sm:$0xff] %vm444_vm1, %v4017_v8 }
 0x256   :  { %v4025_v50 = vpop.trf.xlu1 }
 0x257   :  { %5176 = vst [vmem:[#allocation74_spill] sm:$0xff] %v4025_v50  ;;  %2285 = vst.msk [vmem:[%s4997_s7 + $0x300] sm:$0xff] %vm444_vm1, %v4025_v50  ;;  %v5180_v50 = vmov 1  }
 0x258   :  { %v4032_v11 = vpop.trf.xlu0 }
 0x259   :  { %5177 = vst [vmem:[#allocation75_spill] sm:$0xff] %v4032_v11  ;;  %513 = vperm.xlu1 %2875, %v3495_v41   ;;  %2270 = vst.msk [vmem:[%s4997_s7 + $0x288] sm:$0xff] %vm444_vm1, %v4032_v11 }
 0x25a   :  { %v4040_v19 = vpop.trf.xlu1 }
 0x25b   :  { %5178 = vst [vmem:[#allocation76_spill] sm:$0xff] %v4040_v19  ;;  %2286 = vst.msk [vmem:[%s4997_s7 + $0x308] sm:$0xff] %vm444_vm1, %v4040_v19 }
 0x25c   :  { %v4047_v8 = vpop.trf.xlu0 }
 0x25d   :  { %5179 = vst [vmem:[#allocation77_spill] sm:$0xff] %v4047_v8  ;;  %2876 = vset.pattern.permute.xlu1 %v5180_v50  ;;  %2271 = vst.msk [vmem:[%s4997_s7 + $0x290] sm:$0xff] %vm444_vm1, %v4047_v8 }
 0x25e   :  { %737 = vperm.xlu1 %2876, %v3495_v41   ;;  %v4056_v11 = vpop.trf.xlu1 }
 0x25f   :  { %5181 = vst [vmem:[#allocation78_spill] sm:$0xff] %v4056_v11  ;;  %2287 = vst.msk [vmem:[%s4997_s7 + $0x310] sm:$0xff] %vm444_vm1, %v4056_v11 }
 0x260   :  { %v4063_v19 = vpop.trf.xlu0 }
 0x261   :  { %5182 = vst [vmem:[#allocation79_spill] sm:$0xff] %v4063_v19  ;;  %2272 = vst.msk [vmem:[%s4997_s7 + $0x298] sm:$0xff] %vm444_vm1, %v4063_v19 }
 0x262   :  { %2877 = vset.pattern.permute.xlu1 %v5160_v3  ;;  %v4071_v8 = vpop.trf.xlu1 }
 0x263   :  { %5183 = vst [vmem:[#allocation80_spill] sm:$0xff] %v4071_v8  ;;  %518 = vperm.xlu1 %2877, %v3504_v43   ;;  %2288 = vst.msk [vmem:[%s4997_s7 + $0x318] sm:$0xff] %vm444_vm1, %v4071_v8 }
 0x264   :  { %v4079_v11 = vpop.trf.xlu0 }
 0x265   :  { %5184 = vst [vmem:[#allocation81_spill] sm:$0xff] %v4079_v11  ;;  %2273 = vst.msk [vmem:[%s4997_s7 + $0x2a0] sm:$0xff] %vm444_vm1, %v4079_v11 }
 0x266   :  { %v4086_v19 = vpop.trf.xlu1 }
 0x267   :  { %5185 = vst [vmem:[#allocation82_spill] sm:$0xff] %v4086_v19  ;;  %523 = vperm.xlu1 %2877, %v3513_v45   ;;  %2289 = vst.msk [vmem:[%s4997_s7 + $0x320] sm:$0xff] %vm444_vm1, %v4086_v19 }
 0x268   :  { %v4094_v13 = vpop.trf.xlu0 }
 0x269   :  { %5186 = vst [vmem:[#allocation83_spill] sm:$0xff] %v4094_v13  ;;  %2274 = vst.msk [vmem:[%s4997_s7 + $0x2a8] sm:$0xff] %vm444_vm1, %v4094_v13 }
 0x26a   :  { %v4101_v8 = vpop.trf.xlu1 }
 0x26b   :  { %5187 = vst [vmem:[#allocation84_spill] sm:$0xff] %v4101_v8  ;;  %2878 = vset.pattern.permute.xlu1 %v5180_v50  ;;  %2290 = vst.msk [vmem:[%s4997_s7 + $0x328] sm:$0xff] %vm444_vm1, %v4101_v8 }
 0x26c   :  { %745 = vperm.xlu1 %2878, %v3513_v45   ;;  %v4110_v19 = vpop.trf.xlu0 }
 0x26d   :  { %5188 = vst [vmem:[#allocation85_spill] sm:$0xff] %v4110_v19  ;;  %2275 = vst.msk [vmem:[%s4997_s7 + $0x2b0] sm:$0xff] %vm444_vm1, %v4110_v19 }
 0x26e   :  { %v4117_v11 = vpop.trf.xlu1 }
 0x26f   :  { %5189 = vst [vmem:[#allocation86_spill] sm:$0xff] %v4117_v11  ;;  %2291 = vst.msk [vmem:[%s4997_s7 + $0x330] sm:$0xff] %vm444_vm1, %v4117_v11 }
 0x270   :  { %2879 = vset.pattern.permute.xlu1 %v5160_v3  ;;  %v4125_v8 = vpop.trf.xlu0 }
 0x271   :  { %5190 = vst [vmem:[#allocation87_spill] sm:$0xff] %v4125_v8  ;;  %528 = vperm.xlu1 %2879, %v3524_v48   ;;  %697 = vperm.xlu0 %2886, %v3405_v21   ;;  %2276 = vst.msk [vmem:[%s4997_s7 + $0x2b8] sm:$0xff] %vm444_vm1, %v4125_v8 }
 0x272   :  { %v4134_v13 = vpop.trf.xlu1 }
 0x273   :  { %5191 = vst [vmem:[#allocation88_spill] sm:$0xff] %v4134_v13  ;;  %2292 = vst.msk [vmem:[%s4997_s7 + $0x338] sm:$0xff] %vm444_vm1, %v4134_v13 }
 0x274   :  { %v4141_v11 = vpop.trf.xlu0 }
 0x275   :  { %5192 = vst [vmem:[#allocation89_spill] sm:$0xff] %v4141_v11  ;;  %533 = vperm.xlu1 %2879, %v3533_v51   ;;  %705 = vperm.xlu0 %2886, %v3423_v25   ;;  %2277 = vst.msk [vmem:[%s4997_s7 + $0x2c0] sm:$0xff] %vm444_vm1, %v4141_v11  ;;  %v3292_v11 = vmov 2  }
 0x276   :  { %v4150_v19 = vpop.trf.xlu1 }
 0x277   :  { %5193 = vst [vmem:[#allocation90_spill] sm:$0xff] %v4150_v19  ;;  %2293 = vst.msk [vmem:[%s4997_s7 + $0x340] sm:$0xff] %vm444_vm1, %v4150_v19 }
 0x278   :  { %v4157_v13 = vpop.trf.xlu0 }
 0x279   :  { %5194 = vst [vmem:[#allocation91_spill] sm:$0xff] %v4157_v13  ;;  %2880 = vset.pattern.permute.xlu1 %v5180_v50  ;;  %709 = vperm.xlu0 %2886, %v3432_v27   ;;  %2278 = vst.msk [vmem:[%s4997_s7 + $0x2c8] sm:$0xff] %vm444_vm1, %v4157_v13 }
 0x27a   :  { %753 = vperm.xlu1 %2880, %v3533_v51   ;;  %v4167_v8 = vpop.trf.xlu1 }
 0x27b   :  { %5195 = vst [vmem:[#allocation92_spill] sm:$0xff] %v4167_v8  ;;  %2294 = vst.msk [vmem:[%s4997_s7 + $0x348] sm:$0xff] %vm444_vm1, %v4167_v8 }
 0x27c   :  { %v4174_v19 = vpop.trf.xlu0 }
 0x27d   :  { %5196 = vst [vmem:[#allocation93_spill] sm:$0xff] %v4174_v19  ;;  %713 = vperm.xlu0 %2886, %v3441_v29   ;;  %2279 = vst.msk [vmem:[%s4997_s7 + $0x2d0] sm:$0xff] %vm444_vm1, %v4174_v19 }
 0x27e   :  { %2881 = vset.pattern.permute.xlu1 %v5160_v3  ;;  %v4183_v50 = vpop.trf.xlu1 }
 0x27f   :  { %5197 = vst [vmem:[#allocation94_spill] sm:$0xff] %v4183_v50  ;;  %538 = vperm.xlu1 %2881, %v3544_v55   ;;  %2295 = vst.msk [vmem:[%s4997_s7 + $0x350] sm:$0xff] %vm444_vm1, %v4183_v50 }
 0x280   :  { %v4191_v8 = vpop.trf.xlu0 }
 0x281   :  { %5198 = vst [vmem:[#allocation95_spill] sm:$0xff] %v4191_v8  ;;  %717 = vperm.xlu0 %2886, %v3450_v31   ;;  %2280 = vst.msk [vmem:[%s4997_s7 + $0x2d8] sm:$0xff] %vm444_vm1, %v4191_v8 }
 0x282   :  { %v4199_v3 = vpop.trf.xlu1 }
 0x283   :  { %5199 = vst [vmem:[#allocation96_spill] sm:$0xff] %v4199_v3  ;;  %2882 = vset.pattern.permute.xlu1 %v3292_v11  ;;  %2296 = vst.msk [vmem:[%s4997_s7 + $0x358] sm:$0xff] %vm444_vm1, %v4199_v3  ;;  %v5067_v3 = vmov 3  }
 0x284   :  { %952 = vperm.xlu1 %2882, %v3486_v39   ;;  %v4207_v50 = vpop.trf.xlu0 }
 0x285   :  { %5200 = vst [vmem:[#allocation97_spill] sm:$0xff] %v4207_v50  ;;  %721 = vperm.xlu0 %2886, %v3459_v33   ;;  %2281 = vst.msk [vmem:[%s4997_s7 + $0x2e0] sm:$0xff] %vm444_vm1, %v4207_v50 }
 0x286   :  { %v4215_v13 = vpop.trf.xlu1 }
 0x287   :  { %5201 = vst [vmem:[#allocation98_spill] sm:$0xff] %v4215_v13  ;;  %2297 = vst.msk [vmem:[%s4997_s7 + $0x360] sm:$0xff] %vm444_vm1, %v4215_v13 }
 0x288   :  { %2883 = vset.pattern.permute.xlu1 %v5067_v3  ;;  %v4223_v19 = vpop.trf.xlu0 }
 0x289   :  { %5202 = vst [vmem:[#allocation99_spill] sm:$0xff] %v4223_v19  ;;  %1139 = vperm.xlu1 %2883, %v3414_v23   ;;  %725 = vperm.xlu0 %2886, %v3468_v35   ;;  %2282 = vst.msk [vmem:[%s4997_s7 + $0x2e8] sm:$0xff] %vm444_vm1, %v4223_v19 }
 0x28a   :  { %v4232_v8 = vpop.trf.xlu1 }
 0x28b   :  { %5203 = vst [vmem:[#allocation100_spill] sm:$0xff] %v4232_v8  ;;  %2298 = vst.msk [vmem:[%s4997_s7 + $0x368] sm:$0xff] %vm444_vm1, %v4232_v8 }
 0x28c   :  { %v4239_v3 = vpop.trf.xlu0 }
 0x28d   :  { %5204 = vst [vmem:[#allocation101_spill] sm:$0xff] %v4239_v3  ;;  %1143 = vperm.xlu1 %2883, %v3423_v25   ;;  %729 = vperm.xlu0 %2886, %v3477_v37   ;;  %2283 = vst.msk [vmem:[%s4997_s7 + $0x2f0] sm:$0xff] %vm444_vm1, %v4239_v3 }
 0x28e   :  { %v4248_v13 = vpop.trf.xlu1 }
 0x28f   :  { %5205 = vst [vmem:[#allocation102_spill] sm:$0xff] %v4248_v13  ;;  %2299 = vst.msk [vmem:[%s4997_s7 + $0x370] sm:$0xff] %vm444_vm1, %v4248_v13 }
 0x290   :  { %v4255_v8 = vpop.trf.xlu0 }
 0x291   :  { %5206 = vst [vmem:[#allocation103_spill] sm:$0xff] %v4255_v8  ;;  %1147 = vperm.xlu1 %2883, %v3432_v27   ;;  %733 = vperm.xlu0 %2886, %v3486_v39   ;;  %2284 = vst.msk [vmem:[%s4997_s7 + $0x2f8] sm:$0xff] %vm444_vm1, %v4255_v8 }
 0x292   :  { %v4264_v50 = vpop.trf.xlu1 }
 0x293   :  { %5207 = vst [vmem:[#allocation104_spill] sm:$0xff] %v4264_v50  ;;  %2300 = vst.msk [vmem:[%s4997_s7 + $0x378] sm:$0xff] %vm444_vm1, %v4264_v50 }
 0x294   :  { %v4271_v13 = vpop.trf.xlu0 }
 0x295   :  { %5208 = vst [vmem:[#allocation105_spill] sm:$0xff] %v4271_v13  ;;  %1151 = vperm.xlu1 %2883, %v3441_v29   ;;  %741 = vperm.xlu0 %2886, %v3504_v43   ;;  %2301 = vst.msk [vmem:[%s4997_s7 + $0x380] sm:$0xff] %vm444_vm1, %v4271_v13 }
 0x298   :  { %v4280_v19 = vpop.trf.xlu0 }
 0x299   :  { %5209 = vst [vmem:[#allocation106_spill] sm:$0xff] %v4280_v19  ;;  %1155 = vperm.xlu1 %2883, %v3450_v31   ;;  %749 = vperm.xlu0 %2886, %v3524_v48   ;;  %2302 = vst.msk [vmem:[%s4997_s7 + $0x388] sm:$0xff] %vm444_vm1, %v4280_v19 }
 0x29c   :  { %v4289_v50 = vpop.trf.xlu0 }
 0x29d   :  { %5210 = vst [vmem:[#allocation107_spill] sm:$0xff] %v4289_v50  ;;  %1159 = vperm.xlu1 %2883, %v3459_v33   ;;  %757 = vperm.xlu0 %2886, %v3544_v55   ;;  %2303 = vst.msk [vmem:[%s4997_s7 + $0x390] sm:$0xff] %vm444_vm1, %v4289_v50 }
 0x2a0   :  { %v4298_v13 = vpop.trf.xlu0 }
 0x2a1   :  { %5211 = vst [vmem:[#allocation108_spill] sm:$0xff] %v4298_v13  ;;  %1163 = vperm.xlu1 %2883, %v3468_v35   ;;  %2887 = vset.pattern.permute.xlu0 %v3292_v11  ;;  %2304 = vst.msk [vmem:[%s4997_s7 + $0x398] sm:$0xff] %vm444_vm1, %v4298_v13 }
 0x2a2   :  { %916 = vperm.xlu0 %2887, %v3405_v21  }
 0x2a4   :  { %v4307_v19 = vpop.trf.xlu0 }
 0x2a5   :  { %5212 = vst [vmem:[#allocation109_spill] sm:$0xff] %v4307_v19  ;;  %1167 = vperm.xlu1 %2883, %v3477_v37   ;;  %2305 = vst.msk [vmem:[%s4997_s7 + $0x3a0] sm:$0xff] %vm444_vm1, %v4307_v19 }
 0x2a6   :  { %v4315_v50 = vpop.permute.xlu1 %463  ;;  %920 = vperm.xlu0 %2887, %v3414_v23  }
 0x2a8   :  { %v4318_v11 = vpop.trf.xlu0 }
 0x2a9   :  { %5213 = vst [vmem:[#allocation110_spill] sm:$0xff] %v4318_v11  ;;  %1171 = vperm.xlu1 %2883, %v3486_v39   ;;  %2306 = vst.msk [vmem:[%s4997_s7 + $0x3a8] sm:$0xff] %vm444_vm1, %v4318_v11 }
 0x2aa   :  { %v4326_v13 = vpop.permute.xlu1 %468  ;;  %924 = vperm.xlu0 %2887, %v3423_v25  }
 0x2ac   :  { %v4329_v3 = vpop.trf.xlu0 }
 0x2ad   :  { %5214 = vst [vmem:[#allocation111_spill] sm:$0xff] %v4329_v3  ;;  %1175 = vperm.xlu1 %2883, %v3495_v41   ;;  %2307 = vst.msk [vmem:[%s4997_s7 + $0x3b0] sm:$0xff] %vm444_vm1, %v4329_v3 }
 0x2ae   :  { %928 = vperm.xlu0 %2887, %v3432_v27  }
 0x2af   :  { %v4338_v19 = vpop.permute.xlu1 %701 }
 0x2b0   :  { %5215 = vst [vmem:[#allocation112_spill] sm:$0xff] %v4338_v19  ;;  %v4340_v8 = vpop.trf.xlu0 }
 0x2b1   :  { %5216 = vst [vmem:[#allocation113_spill] sm:$0xff] %v4340_v8  ;;  %1179 = vperm.xlu1 %2883, %v3504_v43   ;;  %2308 = vst.msk [vmem:[%s4997_s7 + $0x3b8] sm:$0xff] %vm444_vm1, %v4340_v8 }
 0x2b2   :  { %932 = vperm.xlu0 %2887, %v3441_v29  }
 0x2b4   :  { %v4349_v11 = vpop.permute.xlu1 %473  ;;  %v4351_v60 = vpop.trf.xlu0 }
 0x2b5   :  { %5217 = vst [vmem:[#allocation114_spill] sm:$0xff] %v4351_v60  ;;  %1183 = vperm.xlu1 %2883, %v3513_v45   ;;  %2309 = vst.msk [vmem:[%s4997_s7 + $0x3c0] sm:$0xff] %vm444_vm1, %v4351_v60 }
 0x2b6   :  { %936 = vperm.xlu0 %2887, %v3450_v31  }
 0x2b8   :  { %v4360_v3 = vpop.permute.xlu1 %478  ;;  %v4362_v17 = vpop.trf.xlu0 }
 0x2b9   :  { %5218 = vst [vmem:[#allocation115_spill] sm:$0xff] %v4362_v17  ;;  %1187 = vperm.xlu1 %2883, %v3524_v48   ;;  %2310 = vst.msk [vmem:[%s4997_s7 + $0x3c8] sm:$0xff] %vm444_vm1, %v4362_v17 }
 0x2ba   :  { %940 = vperm.xlu0 %2887, %v3459_v33  }
 0x2bc   :  { %v4371_v8 = vpop.permute.xlu1 %483  ;;  %v4373_v62 = vpop.trf.xlu0 }
 0x2bd   :  { %5219 = vst [vmem:[#allocation116_spill] sm:$0xff] %v4373_v62  ;;  %1191 = vperm.xlu1 %2883, %v3533_v51   ;;  %2311 = vst.msk [vmem:[%s4997_s7 + $0x3d0] sm:$0xff] %vm444_vm1, %v4373_v62  ;;  %v3294_v62 = vmov 4  }
 0x2be   :  { %944 = vperm.xlu0 %2887, %v3468_v35  }
 0x2c0   :  { %v4382_v60 = vpop.permute.xlu1 %488  ;;  %v4384_v15 = vpop.trf.xlu0 }
 0x2c1   :  { %5220 = vst [vmem:[#allocation117_spill] sm:$0xff] %v4384_v15  ;;  %1195 = vperm.xlu1 %2883, %v3544_v55   ;;  %2312 = vst.msk [vmem:[%s4997_s7 + $0x3d8] sm:$0xff] %vm444_vm1, %v4384_v15 }
 0x2c2   :  { %948 = vperm.xlu0 %2887, %v3477_v37  }
 0x2c4   :  { %v4393_v17 = vpop.permute.xlu1 %493  ;;  %v4395_v53 = vpop.trf.xlu0 }
 0x2c5   :  { %5221 = vst [vmem:[#allocation118_spill] sm:$0xff] %v4395_v53  ;;  %2884 = vset.pattern.permute.xlu1 %v3294_v62  ;;  %2313 = vst.msk [vmem:[%s4997_s7 + $0x3e0] sm:$0xff] %vm444_vm1, %v4395_v53 }
 0x2c6   :  { %1386 = vperm.xlu1 %2884, %v3477_v37   ;;  %956 = vperm.xlu0 %2887, %v3495_v41  }
 0x2c8   :  { %v4404_v0 = vpop.permute.xlu1 %498  ;;  %v4406_v15 = vpop.trf.xlu0 }
 0x2c9   :  { %5222 = vst [vmem:[#allocation119_spill] sm:$0xff] %v4406_v15  ;;  %2314 = vst.msk [vmem:[%s4997_s7 + $0x3e8] sm:$0xff] %vm444_vm1, %v4406_v15 }
 0x2ca   :  { %2885 = vset.pattern.permute.xlu1 %v5098_v1  ;;  %960 = vperm.xlu0 %2887, %v3504_v43  }
 0x2cb   :  { %1633 = vperm.xlu1 %2885, %v3544_v55  }
 0x2cc   :  { %v4416_v53 = vpop.permute.xlu1 %503  ;;  %v4418_v47 = vpop.trf.xlu0 }
 0x2cd   :  { %5223 = vst [vmem:[#allocation120_spill] sm:$0xff] %v4418_v47  ;;  %2315 = vst.msk [vmem:[%s4997_s7 + $0x3f0] sm:$0xff] %vm444_vm1, %v4418_v47 }
 0x2ce   :  { %964 = vperm.xlu0 %2887, %v3513_v45  }
 0x2cf   :  { %1629 = vperm.xlu1 %2885, %v3533_v51  }
 0x2d0   :  { %v509_v15 = vpop.permute.xlu1 %508  ;;  %v4427_v1 = vpop.trf.xlu0 }
 0x2d1   :  { %5224 = vst [vmem:[#allocation121_spill] sm:$0xff] %v4427_v1  ;;  %2316 = vst.msk [vmem:[%s4997_s7 + $0x3f8] sm:$0xff] %vm444_vm1, %v4427_v1 }
 0x2d2   :  { %968 = vperm.xlu0 %2887, %v3524_v48  }
 0x2d3   :  { %1625 = vperm.xlu1 %2885, %v3524_v48  }
 0x2d4   :  { %v514_v5 = vpop.permute.xlu1 %513 }
 0x2d6   :  { %972 = vperm.xlu0 %2887, %v3533_v51  }
 0x2d7   :  { %1621 = vperm.xlu1 %2885, %v3513_v45  }
 0x2d9   :  { %v4438_v47 = vpop.permute.xlu1 %737 }
 0x2da   :  { %976 = vperm.xlu0 %2887, %v3544_v55  }
 0x2db   :  { %1617 = vperm.xlu1 %2885, %v3504_v43  }
 0x2de   :  { %v519_v58 = vpop.permute.xlu1 %518  ;;  %2888 = vset.pattern.permute.xlu0 %v5225_v22 }
 0x2df   :  { %1613 = vperm.xlu1 %2885, %v3495_v41   ;;  %1135 = vperm.xlu0 %2888, %v3405_v21  }
 0x2e2   :  { %v524_v1 = vpop.permute.xlu1 %523 }
 0x2e3   :  { %1609 = vperm.xlu1 %2885, %v3486_v39   ;;  %2889 = vset.pattern.permute.xlu0 %v3294_v62 }
 0x2e4   :  { %1354 = vperm.xlu0 %2889, %v3405_v21  }
 0x2e7   :  { %v4447_v19 = vpop.permute.xlu1 %745  ;;  %1605 = vperm.xlu1 %2885, %v3477_v37  }
 0x2e8   :  { %1358 = vperm.xlu0 %2889, %v3414_v23  }
 0x2eb   :  { %1601 = vperm.xlu1 %2885, %v3468_v35  }
 0x2ec   :  { %v529_v24 = vpop.permute.xlu1 %528  ;;  %1362 = vperm.xlu0 %2889, %v3423_v25   ;;  %v4453_v22 = vpop.permute.xlu0 %697 }
 0x2ed   :  { %5226 = vst [vmem:[#allocation122_spill] sm:$0xff] %v4453_v22 }
 0x2ef   :  { %1597 = vperm.xlu1 %2885, %v3459_v33  }
 0x2f0   :  { %v534_v26 = vpop.permute.xlu1 %533  ;;  %1366 = vperm.xlu0 %2889, %v3432_v27   ;;  %v4457_v62 = vpop.permute.xlu0 %705 }
 0x2f1   :  { %5227 = vst [vmem:[#allocation123_spill] sm:$0xff] %v4457_v62  ;;  %v555_v32 = vadd.f32 %v534_v26, %v3752_v9  ;;  %v551_v9 = vadd.f32 %v514_v5, %v3694_v16  ;;  %v548_v16 = vadd.f32 %v4404_v0, %v3652_v10  ;;  %v546_v0 = vadd.f32 %v4382_v60, %v3623_v4 }
 0x2f2   :  { %v545_v10 = vadd.f32 %v4371_v8, %v3609_v2  ;;  %v544_v4 = vadd.f32 %v4360_v3, %v3595_v63  ;;  %v543_v8 = vadd.f32 %v4349_v11, %v3581_v61  ;;  %v542_v63 = vadd.f32 %v4326_v13, %v3567_v59 }
 0x2f3   :  { %1593 = vperm.xlu1 %2885, %v3450_v31   ;;  %v541_v61 = vadd.f32 %v4315_v50, %v3553_v57 }
 0x2f4   :  { %1370 = vperm.xlu0 %2889, %v3441_v29   ;;  %v4461_v37 = vpop.permute.xlu0 %709 }
 0x2f5   :  { %5228 = vst [vmem:[#allocation124_spill] sm:$0xff] %v4461_v37  ;;  %v4463_v28 = vpop.permute.xlu1 %753  ;;  %v554_v37 = vadd.f32 %v529_v24, %v3736_v52 }
 0x2f7   :  { %1589 = vperm.xlu1 %2885, %v3441_v29   ;;  %v553_v29 = vadd.f32 %v524_v1, %v3722_v20  ;;  %v3296_v1 = vmov 7  }
 0x2f8   :  { %1374 = vperm.xlu0 %2889, %v3450_v31   ;;  %v4467_v22 = vpop.permute.xlu0 %713 }
 0x2fa   :  { %v539_v30 = vpop.permute.xlu1 %538 }
 0x2fb   :  { %v556_v34 = vadd.f32 %v539_v30, %v3766_v7  ;;  %1585 = vperm.xlu1 %2885, %v3432_v27   ;;  %v552_v30 = vadd.f32 %v519_v58, %v3708_v18  ;;  %v5229_v18 = vmov 0.0  }
 0x2fc   :  { %1378 = vperm.xlu0 %2889, %v3459_v33   ;;  %v4473_v62 = vpop.permute.xlu0 %717 }
 0x2fd   :  { %2898 = vtanh.f32 %v556_v34  ;;  %v550_v34 = vadd.f32 %v509_v15, %v3680_v14  ;;  %v547_v15 = vadd.f32 %v4393_v17, %v3637_v6  ;;  %v3297_v17 = vmov 6  }
 0x2fe   :  { %2900 = vtanh.f32 %v555_v32 }
 0x2ff   :  { %1581 = vperm.xlu1 %2885, %v3423_v25   ;;  %v4478_v31 = vpop.permute.xlu1 %952  ;;  %2902 = vtanh.f32 %v554_v37  ;;  %v549_v37 = vadd.f32 %v4416_v53, %v3666_v12 }
 0x300   :  { %1382 = vperm.xlu0 %2889, %v3468_v35   ;;  %v4481_v26 = vpop.permute.xlu0 %721  ;;  %2904 = vtanh.f32 %v553_v29 }
 0x301   :  { %2906 = vtanh.f32 %v552_v30 }
 0x302   :  { %2908 = vtanh.f32 %v551_v9 }
 0x303   :  { %1577 = vperm.xlu1 %2885, %v3414_v23   ;;  %2910 = vtanh.f32 %v550_v34 }
 0x304   :  { %v4486_v24 = vpop.permute.xlu1 %1139  ;;  %1390 = vperm.xlu0 %2889, %v3486_v39   ;;  %v4489_v32 = vpop.permute.xlu0 %725  ;;  %2912 = vtanh.f32 %v549_v37 }
 0x305   :  { %2914 = vtanh.f32 %v548_v16 }
 0x306   :  { %2916 = vtanh.f32 %v547_v15  ;;  %v5230_v15 = vmov 5  }
 0x307   :  { %2892 = vset.pattern.permute.xlu1 %v3296_v1  ;;  %2918 = vtanh.f32 %v546_v0 }
 0x308   :  { %2071 = vperm.xlu1 %2892, %v3544_v55   ;;  %v4496_v29 = vpop.permute.xlu1 %1143  ;;  %1394 = vperm.xlu0 %2889, %v3495_v41   ;;  %v4499_v58 = vpop.permute.xlu0 %729  ;;  %2920 = vtanh.f32 %v545_v10 }
 0x309   :  { %2922 = vtanh.f32 %v544_v4 }
 0x30a   :  { %v2899_v5 = vpop.eup %2898  ;;  %2924 = vtanh.f32 %v543_v8  ;;  %v5233_v8 = vld [vmem:[#allocation20_spill] sm:$0xff] }
 0x30b   :  { %2574 = vmatpush3.msra.mxu0 %v2899_v5  ;;  %v2901_v14 = vpop.eup %2900  ;;  %2926 = vtanh.f32 %v542_v63  ;;  %v5235_v63 = vld [vmem:[#allocation124_spill] sm:$0xff] }
 0x30c   :  { %2067 = vperm.xlu1 %2892, %v3533_v51   ;;  %v4506_v12 = vpop.permute.xlu1 %1147  ;;  %2575 = vmatprep.subr.mxu0 %v5229_v18  ;;  %v4509_v20 = vpop.permute.xlu0 %733  ;;  %2928 = vtanh.f32 %v541_v61 }
 0x30d   :  { %2576 = vmatpush3.msra.mxu0 %v2901_v14  ;;  %1398 = vperm.xlu0 %2889, %v3504_v43   ;;  %v2903_v52 = vpop.eup %2902 }
 0x30e   :  { %2577 = vmatprep.subr.mxu0 %v5229_v18  ;;  %v2905_v6 = vpop.eup %2904 }
 0x30f   :  { %2578 = vmatpush3.msra.mxu0 %v2903_v52  ;;  %v2907_v60 = vpop.eup %2906  ;;  %v769_v52 = vadd.f32 %v4509_v20, %v3488_v40  ;;  %v767_v20 = vadd.f32 %v4489_v32, %v3470_v36 }
 0x310   :  { %2893 = vset.pattern.permute.xlu1 %v3297_v17  ;;  %v4518_v7 = vpop.permute.xlu1 %1151  ;;  %2579 = vmatprep.subr.mxu0 %v5229_v18  ;;  %v742_v53 = vpop.permute.xlu0 %741 }
 0x311   :  { %1844 = vperm.xlu1 %2893, %v3524_v48   ;;  %2580 = vmatpush3.msra.mxu0 %v2905_v6  ;;  %v2909_v2 = vpop.eup %2908 }
 0x312   :  { %1402 = vperm.xlu0 %2889, %v3513_v45   ;;  %2581 = vmatprep.subr.mxu0 %v5229_v18  ;;  %v2911_v3 = vpop.eup %2910 }
 0x313   :  { %2582 = vmatpush3.msra.mxu0 %v2907_v60  ;;  %v2913_v37 = vpop.eup %2912 }
 0x314   :  { %v4528_v30 = vpop.permute.xlu1 %1155  ;;  %2583 = vmatprep.subr.mxu0 %v5229_v18  ;;  %v750_v9 = vpop.permute.xlu0 %749 }
 0x315   :  { %2894 = vset.pattern.permute.xlu1 %v3296_v1  ;;  %2584 = vmatpush3.msra.mxu0 %v2909_v2  ;;  %v2915_v57 = vpop.eup %2914  ;;  %v773_v13 = vadd.f32 %v750_v9, %v3526_v49  ;;  %v771_v49 = vadd.f32 %v742_v53, %v3506_v44  ;;  %v4609_v2 = vld [vmem:[%s4996_s6] sm:$0x1]  ;;  %v5234_v9 = vld [vmem:[#allocation18_spill] sm:$0xff] }
 0x316   :  { %1406 = vperm.xlu0 %2889, %v3524_v48   ;;  %2063 = vperm.xlu1 %2894, %v3524_v48   ;;  %v774_v48 = vadd.f32 %v4463_v28, %v3537_v54  ;;  %v2917_v50 = vpop.eup %2916  ;;  %v772_v54 = vadd.f32 %v4447_v19, %v3515_v46  ;;  %v770_v19 = vadd.f32 %v4438_v47, %v3497_v42 }
 0x317   :  { %2585 = vmatprep.subr.mxu0 %v5229_v18  ;;  %v2919_v5 = vpop.eup %2918  ;;  %v768_v47 = vadd.f32 %v4499_v58, %v3479_v38  ;;  %v5231_v58 = vld [vmem:[#allocation23_spill] sm:$0xff] }
 0x318   :  { %2586 = vmatpush3.msra.mxu0 %v2911_v3  ;;  %v4539_v11 = vpop.permute.xlu1 %1159  ;;  %v758_v34 = vpop.permute.xlu0 %757  ;;  %v763_v3 = vadd.f32 %v5235_v63, %v5234_v9  ;;  %v5248_v63 = vld [vmem:[#allocation19_spill] sm:$0xff] }
 0x319   :  { %2587 = vmatprep.subr.mxu0 %v5229_v18  ;;  %v775_v59 = vadd.f32 %v758_v34, %v3546_v56  ;;  %v2921_v14 = vpop.eup %2920 }
 0x31a   :  { %2588 = vmatpush3.msra.mxu0 %v2913_v37  ;;  %1410 = vperm.xlu0 %2889, %v3533_v51   ;;  %v2923_v44 = vpop.eup %2922 }
 0x31b   :  { %2895 = vset.pattern.permute.xlu1 %v3297_v17  ;;  %2589 = vmatprep.subr.mxu0 %v5229_v18  ;;  %2930 = vtanh.f32 %v775_v59  ;;  %v2925_v0 = vpop.eup %2924  ;;  %v5237_v59 = vld [vmem:[#allocation17_spill] sm:$0xff] }
 0x31c   :  { %1840 = vperm.xlu1 %2895, %v3513_v45   ;;  %2590 = vmatpush3.msra.mxu0 %v2915_v57  ;;  %v4550_v56 = vpop.permute.xlu1 %1163  ;;  %2932 = vtanh.f32 %v774_v48  ;;  %v2927_v6 = vpop.eup %2926  ;;  %v5238_v48 = vld [vmem:[#allocation123_spill] sm:$0xff] }
 0x31d   :  { %2591 = vmatprep.subr.mxu0 %v5229_v18  ;;  %v4553_v28 = vpop.permute.xlu0 %916  ;;  %2934 = vtanh.f32 %v773_v13  ;;  %v2929_v40 = vpop.eup %2928  ;;  %v762_v57 = vadd.f32 %v5238_v48, %v5237_v59  ;;  %v5249_v59 = vld [vmem:[#allocation63_spill] sm:$0xff] }
 0x31e   :  { %2592 = vmatpush3.msra.mxu0 %v2917_v50  ;;  %1414 = vperm.xlu0 %2889, %v3544_v55   ;;  %2936 = vtanh.f32 %v772_v54  ;;  %v5239_v50 = vld [vmem:[#allocation16_spill] sm:$0xff] }
 0x31f   :  { %2593 = vmatprep.subr.mxu0 %v5229_v18  ;;  %2938 = vtanh.f32 %v771_v49  ;;  %v5240_v54 = vld [vmem:[#allocation112_spill] sm:$0xff] }
 0x320   :  { %2896 = vset.pattern.permute.xlu1 %v3296_v1  ;;  %2594 = vmatpush3.msra.mxu0 %v2919_v5  ;;  %v4561_v16 = vpop.permute.xlu1 %1167  ;;  %2940 = vtanh.f32 %v770_v19  ;;  %v5241_v19 = vld [vmem:[#allocation15_spill] sm:$0xff] }
 0x321   :  { %2059 = vperm.xlu1 %2896, %v3513_v45   ;;  %2595 = vmatprep.subr.mxu0 %v5229_v18  ;;  %v4565_v46 = vpop.permute.xlu0 %920  ;;  %2942 = vtanh.f32 %v769_v52 }
 0x322   :  { %2596 = vmatpush3.msra.mxu0 %v2921_v14  ;;  %2890 = vset.pattern.permute.xlu0 %v5230_v15  ;;  %2944 = vtanh.f32 %v768_v47  ;;  %v5242_v15 = vld [vmem:[#allocation122_spill] sm:$0xff] }
 0x323   :  { %2597 = vmatprep.subr.mxu0 %v5229_v18  ;;  %1573 = vperm.xlu0 %2890, %v3405_v21   ;;  %2946 = vtanh.f32 %v767_v20 }
 0x324   :  { %2598 = vmatpush3.msra.mxu0 %v2923_v44  ;;  %v4574_v45 = vpop.permute.xlu1 %1171  ;;  %v760_v44 = vadd.f32 %v5242_v15, %v5241_v19 }
 0x325   :  { %2055 = vperm.xlu1 %2896, %v3504_v43   ;;  %2599 = vmatprep.subr.mxu0 %v5229_v18  ;;  %v4578_v42 = vpop.permute.xlu0 %924 }
 0x326   :  { %2600 = vmatpush3.msra.mxu0 %v2925_v0 }
 0x327   :  { %2601 = vmatprep.subr.mxu0 %v5229_v18  ;;  %2891 = vset.pattern.permute.xlu0 %v3297_v17  ;;  %v766_v17 = vadd.f32 %v4481_v26, %v5231_v58  ;;  %v5244_v58 = vld [vmem:[#allocation21_spill] sm:$0xff] }
 0x328   :  { %2602 = vmatpush3.msra.mxu0 %v2927_v6  ;;  %1852 = vperm.xlu0 %2891, %v3544_v55   ;;  %v4587_v10 = vpop.permute.xlu1 %1175  ;;  %v2931_v53 = vpop.eup %2930  ;;  %v5232_v55 = vld [vmem:[#allocation22_spill] sm:$0xff] }
 0x329   :  { %2051 = vperm.xlu1 %2896, %v3495_v41   ;;  %2603 = vmatprep.subr.mxu0 %v5229_v18  ;;  %v4591_v38 = vpop.permute.xlu0 %928  ;;  %v2933_v36 = vpop.eup %2932  ;;  %v765_v32 = vadd.f32 %v4473_v62, %v5232_v55  ;;  %v764_v62 = vadd.f32 %v4467_v22, %v5233_v8  ;;  %2948 = vtanh.f32 %v766_v17  ;;  %v5236_v22 = vld [vmem:[#allocation24_spill] sm:$0xff]  ;;  %v5245_v17 = vld [vmem:[#allocation71_spill] sm:$0xff] }
 0x32a   :  { %2604 = vmatpush3.msra.mxu0 %v2929_v40  ;;  %2609 = vmatpush3.msra.mxu1 %v2931_v53  ;;  %v2935_v4 = vpop.eup %2934 }
 0x32b   :  { %2610 = vmatprep.subr.mxu1 %v5229_v18  ;;  %2643 = vmatprep.subr.mxu0 %v5229_v18  ;;  %2950 = vtanh.f32 %v765_v32 }
 0x32c   :  { %1848 = vperm.xlu0 %2891, %v3533_v51   ;;  %v4600_v60 = vpop.permute.xlu1 %1179  ;;  %2611 = vmatpush3.msra.mxu1 %v2933_v36  ;;  %v2937_v51 = vpop.eup %2936  ;;  %2952 = vtanh.f32 %v764_v62 }
 0x32d   :  { %2047 = vperm.xlu1 %2896, %v3486_v39   ;;  %2612 = vmatprep.subr.mxu1 %v5229_v18  ;;  %v4604_v26 = vpop.permute.xlu0 %932  ;;  %v2939_v34 = vpop.eup %2938  ;;  %2954 = vtanh.f32 %v763_v3  ;;  %v1209_v48 = vadd.f32 %v4600_v60, %v5249_v59  ;;  %v5262_v59 = vld [vmem:[#allocation38_spill] sm:$0xff] }
 0x32e   :  { %2613 = vmatpush3.msra.mxu1 %v2935_v4  ;;  %2606 = vmatmul.mubr.f32.vlgmr.msra.gmra.mxu0 %v4609_v2  ;;  %v2941_v13 = vpop.eup %2940  ;;  %2956 = vtanh.f32 %v762_v57  ;;  %v5246_v4 = vld [vmem:[#allocation67_spill] sm:$0xff] }
 0x32f   :  { %2614 = vmatprep.subr.mxu1 %v5229_v18  ;;  %2675 = vmatprep.mubr.msk.f32.mxu0 %vm3288_vm0, %v5229_v18  ;;  %v2943_v49 = vpop.eup %2942 }
 0x330   :  { %1836 = vperm.xlu0 %2891, %v3504_v43   ;;  %v1184_v61 = vpop.permute.xlu1 %1183  ;;  %2615 = vmatpush3.msra.mxu1 %v2937_v51  ;;  %v761_v43 = vadd.f32 %v5240_v54, %v5239_v50  ;;  %v2945_v52 = vpop.eup %2944  ;;  %v5247_v51 = vld [vmem:[#allocation65_spill] sm:$0xff]  ;;  %v5251_v54 = vld [vmem:[#allocation59_spill] sm:$0xff] }
 0x331   :  { %2043 = vperm.xlu1 %2896, %v5236_v22   ;;  %2616 = vmatprep.subr.mxu1 %v5229_v18  ;;  %v4622_v37 = vpop.permute.xlu0 %936  ;;  %v2947_v0 = vpop.eup %2946  ;;  %v1210_v9 = vadd.f32 %v1184_v61, %v5247_v51  ;;  %v5250_v61 = vld [vmem:[#allocation61_spill] sm:$0xff] }
 0x332   :  { %2617 = vmatpush3.msra.mxu1 %v2939_v34  ;;  %2958 = vtanh.f32 %v761_v43  ;;  %v1208_v57 = vadd.f32 %v4587_v10, %v5250_v61  ;;  %v1207_v43 = vadd.f32 %v4574_v45, %v5251_v54  ;;  %v5253_v45 = vld [vmem:[#allocation55_spill] sm:$0xff] }
 0x333   :  { %2618 = vmatprep.subr.mxu1 %v5229_v18  ;;  %2960 = vtanh.f32 %v760_v44  ;;  %v1205_v19 = vadd.f32 %v4550_v56, %v5253_v45  ;;  %v5255_v56 = vld [vmem:[#allocation51_spill] sm:$0xff] }
 0x334   :  { %1832 = vperm.xlu0 %2891, %v3495_v41   ;;  %v1188_v5 = vpop.permute.xlu1 %1187  ;;  %2619 = vmatpush3.msra.mxu1 %v2941_v13 }
 0x335   :  { %2039 = vperm.xlu1 %2896, %v3468_v35   ;;  %2620 = vmatprep.subr.mxu1 %v5229_v18  ;;  %v4632_v14 = vpop.permute.xlu0 %940  ;;  %v1211_v8 = vadd.f32 %v1188_v5, %v5246_v4 }
 0x336   :  { %2621 = vmatpush3.msra.mxu1 %v2943_v49  ;;  %v2949_v6 = vpop.eup %2948 }
 0x337   :  { %2622 = vmatprep.subr.mxu1 %v5229_v18 }
 0x338   :  { %1828 = vperm.xlu0 %2891, %v3486_v39   ;;  %v1192_v41 = vpop.permute.xlu1 %1191  ;;  %2623 = vmatpush3.msra.mxu1 %v2945_v52  ;;  %v2951_v20 = vpop.eup %2950  ;;  %v5243_v39 = vld [vmem:[#allocation69_spill] sm:$0xff] }
 0x339   :  { %2035 = vperm.xlu1 %2896, %v3459_v33   ;;  %2624 = vmatprep.subr.mxu1 %v5229_v18  ;;  %v4640_v47 = vpop.permute.xlu0 %944  ;;  %v1212_v53 = vadd.f32 %v1192_v41, %v5243_v39  ;;  %v2953_v32 = vpop.eup %2952 }
 0x33a   :  { %2625 = vmatpush3.msra.mxu1 %v2947_v0  ;;  %v2955_v62 = vpop.eup %2954 }
 0x33b   :  { %2626 = vmatprep.subr.mxu1 %v5229_v18 }
 0x33c   :  { %1824 = vperm.xlu0 %2891, %v5236_v22   ;;  %v1196_v40 = vpop.permute.xlu1 %1195  ;;  %2627 = vmatpush3.msra.mxu1 %v2949_v6  ;;  %v2957_v22 = vpop.eup %2956  ;;  %v1203_v6 = vadd.f32 %v4528_v30, %v5255_v56  ;;  %v5257_v30 = vld [vmem:[#allocation47_spill] sm:$0xff]  ;;  %v5270_v56 = vld [vmem:[#allocation26_spill] sm:$0xff] }
 0x33d   :  { %2031 = vperm.xlu1 %2896, %v5244_v58   ;;  %v1213_v36 = vadd.f32 %v1196_v40, %v5245_v17  ;;  %2628 = vmatprep.subr.mxu1 %v5229_v18  ;;  %v4648_v55 = vpop.permute.xlu0 %948  ;;  %v1201_v17 = vadd.f32 %v4506_v12, %v5257_v30  ;;  %v5260_v12 = vld [vmem:[#allocation40_spill] sm:$0xff] }
 0x33e   :  { %2629 = vmatpush3.msra.mxu1 %v2951_v20  ;;  %v5274_v30 = vld [vmem:[#allocation32_spill] sm:$0xff] }
 0x33f   :  { %2962 = vtanh.f32 %v1213_v36  ;;  %2630 = vmatprep.subr.mxu1 %v5229_v18 }
 0x340   :  { %1820 = vperm.xlu0 %2891, %v3468_v35   ;;  %2631 = vmatpush3.msra.mxu1 %v2953_v32  ;;  %2964 = vtanh.f32 %v1212_v53  ;;  %v2959_v35 = vpop.eup %2958 }
 0x341   :  { %2027 = vperm.xlu1 %2896, %v5248_v63   ;;  %v4655_v3 = vpop.permute.xlu1 %1386  ;;  %2632 = vmatprep.subr.mxu1 %v5229_v18  ;;  %v4658_v34 = vpop.permute.xlu0 %956  ;;  %2966 = vtanh.f32 %v1211_v8  ;;  %v5259_v8 = vld [vmem:[#allocation39_spill] sm:$0xff] }
 0x342   :  { %2633 = vmatpush3.msra.mxu1 %v2955_v62  ;;  %2968 = vtanh.f32 %v1210_v9  ;;  %v2961_v60 = vpop.eup %2960 }
 0x343   :  { %2634 = vmatprep.subr.mxu1 %v5229_v18  ;;  %2970 = vtanh.f32 %v1209_v48  ;;  %v5263_v48 = vld [vmem:[#allocation37_spill] sm:$0xff] }
 0x344   :  { %1816 = vperm.xlu0 %2891, %v3459_v33   ;;  %2635 = vmatpush3.msra.mxu1 %v2957_v22  ;;  %v5252_v33 = vld [vmem:[#allocation57_spill] sm:$0xff]  ;;  %2972 = vtanh.f32 %v1208_v57 }
 0x345   :  { %2023 = vperm.xlu1 %2896, %v3432_v27   ;;  %2636 = vmatprep.subr.mxu1 %v5229_v18  ;;  %v4668_v13 = vpop.permute.xlu0 %960  ;;  %v1206_v10 = vadd.f32 %v4561_v16, %v5252_v33  ;;  %2974 = vtanh.f32 %v1207_v43  ;;  %v5254_v16 = vld [vmem:[#allocation53_spill] sm:$0xff] }
 0x346   :  { %v4670_v50 = vpop.permute.xlu1 %1633  ;;  %2637 = vmatpush3.msra.mxu1 %v2959_v35  ;;  %v1204_v44 = vadd.f32 %v4539_v11, %v5254_v16  ;;  %v5256_v11 = vld [vmem:[#allocation49_spill] sm:$0xff] }
 0x347   :  { %2638 = vmatprep.subr.mxu1 %v5229_v18  ;;  %2976 = vtanh.f32 %v1206_v10  ;;  %v1202_v20 = vadd.f32 %v4518_v7, %v5256_v11  ;;  %v5258_v7 = vld [vmem:[#allocation45_spill] sm:$0xff]  ;;  %v5266_v10 = vld [vmem:[#allocation36_spill] sm:$0xff] }
 0x348   :  { %1812 = vperm.xlu0 %2891, %v5244_v58   ;;  %2639 = vmatpush3.msra.mxu1 %v2961_v60  ;;  %2978 = vtanh.f32 %v1205_v19  ;;  %v1200_v36 = vadd.f32 %v4496_v29, %v5258_v7  ;;  %v5264_v60 = vld [vmem:[#allocation34_spill] sm:$0xff]  ;;  %v5265_v43 = vld [vmem:[#allocation41_spill] sm:$0xff]  ;;  %v990_v45 = vadd.f32 %v4668_v13, %v5266_v10  ;;  %v5284_v10 = vld [vmem:[#allocation27_spill] sm:$0xff] }
 0x349   :  { %2019 = vperm.xlu1 %2896, %v3423_v25   ;;  %v965_v5 = vpop.permute.xlu0 %964  ;;  %2678 = vmatprep.subr.mxu1 %v5229_v18  ;;  %2980 = vtanh.f32 %v1204_v44  ;;  %v988_v54 = vadd.f32 %v4478_v31, %v5264_v60  ;;  %v5268_v31 = vld [vmem:[#allocation35_spill] sm:$0xff]  ;;  %v5269_v13 = vld [vmem:[#allocation101_spill] sm:$0xff]  ;;  %v5282_v60 = vld [vmem:[#allocation28_spill] sm:$0xff] }
 0x34a   :  { %v4680_v49 = vpop.permute.xlu1 %1629  ;;  %2641 = vmatmul.mubr.f32.vlgmr.msra.gmra.mxu1 %v4609_v2  ;;  %2982 = vtanh.f32 %v1203_v6  ;;  %v991_v35 = vadd.f32 %v965_v5, %v5263_v48  ;;  %v5267_v5 = vld [vmem:[#allocation103_spill] sm:$0xff]  ;;  %v989_v16 = vadd.f32 %v4658_v34, %v5268_v31  ;;  %v5272_v11 = vld [vmem:[#allocation33_spill] sm:$0xff] }
 0x34b   :  { %2710 = vmatprep.mubr.msk.f32.mxu1 %vm3288_vm0, %v5229_v18  ;;  %2984 = vtanh.f32 %v1202_v20  ;;  %v1651_v19 = vadd.f32 %v4670_v50, %v5267_v5  ;;  %v980_v50 = vadd.f32 %v4565_v46, %v5270_v56  ;;  %v5271_v34 = vld [vmem:[#allocation99_spill] sm:$0xff]  ;;  %v5273_v46 = vld [vmem:[#allocation97_spill] sm:$0xff] }
 0x34c   :  { %v2963_v15 = vpop.eup %2962  ;;  %1808 = vperm.xlu0 %2891, %v5248_v63   ;;  %v5261_v63 = vld [vmem:[#allocation43_spill] sm:$0xff]  ;;  %2986 = vtanh.f32 %v1201_v17 }
 0x34d   :  { %2015 = vperm.xlu1 %2896, %v3414_v23   ;;  %2679 = vmatpush3.msra.mxu1 %v2963_v15  ;;  %v969_v52 = vpop.permute.xlu0 %968  ;;  %v2965_v41 = vpop.eup %2964 }
 0x34e   :  { %v4691_v0 = vpop.permute.xlu1 %1625  ;;  %2680 = vmatprep.subr.mxu1 %v5229_v18  ;;  %v2967_v40 = vpop.eup %2966  ;;  %v992_v29 = vadd.f32 %v969_v52, %v5262_v59  ;;  %v1650_v52 = vadd.f32 %v4680_v49, %v5269_v13  ;;  %v987_v49 = vadd.f32 %v4648_v55, %v5272_v11  ;;  %v5275_v55 = vld [vmem:[#allocation95_spill] sm:$0xff]  ;;  %v5280_v59 = vld [vmem:[#allocation29_spill] sm:$0xff] }
 0x34f   :  { %2681 = vmatpush3.msra.mxu1 %v2965_v41  ;;  %v2969_v53 = vpop.eup %2968  ;;  %v1649_v6 = vadd.f32 %v4691_v0, %v5271_v34  ;;  %v986_v0 = vadd.f32 %v4640_v47, %v5274_v30  ;;  %v5277_v47 = vld [vmem:[#allocation93_spill] sm:$0xff] }
 0x350   :  { %1804 = vperm.xlu0 %2891, %v3432_v27   ;;  %2682 = vmatprep.subr.mxu1 %v5229_v18  ;;  %v2971_v27 = vpop.eup %2970 }
 0x351   :  { %2011 = vperm.xlu1 %2896, %v3405_v21   ;;  %2683 = vmatpush3.msra.mxu1 %v2967_v40  ;;  %v973_v39 = vpop.permute.xlu0 %972  ;;  %v2973_v4 = vpop.eup %2972 }
 0x352   :  { %v4701_v58 = vpop.permute.xlu1 %1621  ;;  %2684 = vmatprep.subr.mxu1 %v5229_v18  ;;  %v993_v62 = vadd.f32 %v973_v39, %v5259_v8  ;;  %v2975_v22 = vpop.eup %2974 }
 0x353   :  { %2685 = vmatpush3.msra.mxu1 %v2969_v53  ;;  %v1648_v39 = vadd.f32 %v4701_v58, %v5273_v46 }
 0x354   :  { %1800 = vperm.xlu0 %2891, %v3423_v25   ;;  %2686 = vmatprep.subr.mxu1 %v5229_v18  ;;  %v1199_v25 = vadd.f32 %v4486_v24, %v5261_v63  ;;  %v2977_v61 = vpop.eup %2976  ;;  %v5279_v63 = vld [vmem:[#allocation91_spill] sm:$0xff] }
 0x355   :  { %2687 = vmatpush3.msra.mxu1 %v2971_v27  ;;  %v977_v32 = vpop.permute.xlu0 %976 }
 0x356   :  { %v4711_v51 = vpop.permute.xlu1 %1617  ;;  %2688 = vmatprep.subr.mxu1 %v5229_v18  ;;  %v994_v9 = vadd.f32 %v977_v32, %v5260_v12  ;;  %v5278_v12 = vld [vmem:[#allocation30_spill] sm:$0xff] }
 0x357   :  { %2689 = vmatpush3.msra.mxu1 %v2973_v4  ;;  %v1647_v27 = vadd.f32 %v4711_v51, %v5275_v55 }
 0x358   :  { %2988 = vtanh.f32 %v994_v9  ;;  %1796 = vperm.xlu0 %2891, %v3414_v23   ;;  %2690 = vmatprep.subr.mxu1 %v5229_v18  ;;  %v2979_v23 = vpop.eup %2978  ;;  %v984_v9 = vadd.f32 %v4622_v37, %v5278_v12 }
 0x359   :  { %2990 = vtanh.f32 %v1200_v36  ;;  %2691 = vmatpush3.msra.mxu1 %v2975_v22  ;;  %v2981_v15 = vpop.eup %2980  ;;  %v5276_v36 = vld [vmem:[#allocation31_spill] sm:$0xff] }
 0x35a   :  { %2992 = vtanh.f32 %v993_v62  ;;  %v1614_v57 = vpop.permute.xlu1 %1613  ;;  %2692 = vmatprep.subr.mxu1 %v5229_v18  ;;  %v1136_v24 = vpop.permute.xlu0 %1135  ;;  %v985_v58 = vadd.f32 %v4632_v14, %v5276_v36 }
 0x35b   :  { %2994 = vtanh.f32 %v1199_v25  ;;  %2693 = vmatpush3.msra.mxu1 %v2977_v61  ;;  %v1198_v33 = vadd.f32 %v1136_v24, %v5265_v43  ;;  %v2983_v41 = vpop.eup %2982  ;;  %v1646_v8 = vadd.f32 %v1614_v57, %v5277_v47  ;;  %v5283_v43 = vld [vmem:[#allocation87_spill] sm:$0xff] }
 0x35c   :  { %2996 = vtanh.f32 %v992_v29  ;;  %1792 = vperm.xlu0 %2891, %v3405_v21   ;;  %2694 = vmatprep.subr.mxu1 %v5229_v18  ;;  %v2985_v40 = vpop.eup %2984  ;;  %v983_v29 = vadd.f32 %v4604_v26, %v5280_v59 }
 0x35d   :  { %2998 = vtanh.f32 %v991_v35  ;;  %2695 = vmatpush3.msra.mxu1 %v2979_v23  ;;  %v5281_v35 = vld [vmem:[#allocation89_spill] sm:$0xff] }
 0x35e   :  { %3000 = vtanh.f32 %v1198_v33  ;;  %v1610_v44 = vpop.permute.xlu1 %1609  ;;  %2696 = vmatprep.subr.mxu1 %v5229_v18 }
 0x35f   :  { %3002 = vtanh.f32 %v988_v54  ;;  %2697 = vmatpush3.msra.mxu1 %v2981_v15  ;;  %v4736_v21 = vpop.permute.xlu0 %1354  ;;  %v1645_v25 = vadd.f32 %v1610_v44, %v5279_v63  ;;  %v982_v54 = vadd.f32 %v4591_v38, %v5282_v60  ;;  %v5286_v44 = vld [vmem:[#allocation83_spill] sm:$0xff] }
 0x360   :  { %3004 = vtanh.f32 %v990_v45  ;;  %2698 = vmatprep.subr.mxu1 %v5229_v18  ;;  %2897 = vset.pattern.permute.xlu0 %v3296_v1  ;;  %v2987_v1 = vpop.eup %2986  ;;  %v981_v45 = vadd.f32 %v4578_v42, %v5284_v10 }
 0x361   :  { %3006 = vtanh.f32 %v1651_v19  ;;  %2699 = vmatpush3.msra.mxu1 %v2983_v41  ;;  %v5285_v19 = vld [vmem:[#allocation85_spill] sm:$0xff] }
 0x362   :  { %3008 = vtanh.f32 %v989_v16  ;;  %v1606_v20 = vpop.permute.xlu1 %1605  ;;  %2700 = vmatprep.subr.mxu1 %v5229_v18  ;;  %v5287_v41 = vld [vmem:[#allocation25_spill] sm:$0xff] }
 0x363   :  { %3010 = vtanh.f32 %v1650_v52  ;;  %2701 = vmatpush3.msra.mxu1 %v2985_v40  ;;  %v4749_v53 = vpop.permute.xlu0 %1358  ;;  %v1644_v61 = vadd.f32 %v1606_v20, %v5281_v35  ;;  %v979_v56 = vadd.f32 %v4553_v28, %v5287_v41  ;;  %v5295_v41 = vld [vmem:[#allocation66_spill] sm:$0xff] }
 0x364   :  { %3012 = vtanh.f32 %v980_v50  ;;  %2702 = vmatprep.subr.mxu1 %v5229_v18 }
 0x365   :  { %v2989_v17 = vpop.eup %2988  ;;  %3014 = vtanh.f32 %v1649_v6  ;;  %2703 = vmatpush3.msra.mxu1 %v2987_v1  ;;  %v5288_v6 = vld [vmem:[#allocation81_spill] sm:$0xff]  ;;  %v5289_v1 = vld [vmem:[#allocation79_spill] sm:$0xff] }
 0x366   :  { %v2991_v7 = vpop.eup %2990  ;;  %3016 = vtanh.f32 %v987_v49  ;;  %v1602_v32 = vpop.permute.xlu1 %1601  ;;  %2704 = vmatprep.subr.mxu1 %v5229_v18  ;;  %2644 = vmatpush3.msra.mxu0 %v2989_v17 }
 0x367   :  { %v2993_v4 = vpop.eup %2992  ;;  %3018 = vtanh.f32 %v1648_v39  ;;  %2705 = vmatpush3.msra.mxu1 %v2991_v7  ;;  %2645 = vmatprep.subr.mxu0 %v5229_v18  ;;  %v4761_v62 = vpop.permute.xlu0 %1362  ;;  %v1643_v33 = vadd.f32 %v1602_v32, %v5283_v43 }
 0x368   :  { %v2995_v51 = vpop.eup %2994  ;;  %3020 = vtanh.f32 %v986_v0  ;;  %2706 = vmatprep.subr.mxu1 %v5229_v18  ;;  %2646 = vmatpush3.msra.mxu0 %v2993_v4 }
 0x369   :  { %v2997_v14 = vpop.eup %2996  ;;  %3022 = vtanh.f32 %v1647_v27  ;;  %2707 = vmatpush3.msra.mxu1 %v2995_v51  ;;  %2647 = vmatprep.subr.mxu0 %v5229_v18 }
 0x36a   :  { %v2999_v22 = vpop.eup %2998  ;;  %3024 = vtanh.f32 %v985_v58  ;;  %v1598_v48 = vpop.permute.xlu1 %1597  ;;  %2648 = vmatpush3.msra.mxu0 %v2997_v14  ;;  %2708 = vmatprep.subr.mxu1 %v5229_v18  ;;  %v5290_v58 = vld [vmem:[#allocation77_spill] sm:$0xff]  ;;  %v5291_v14 = vld [vmem:[#allocation75_spill] sm:$0xff] }
 0x36b   :  { %v3001_v37 = vpop.eup %3000  ;;  %3026 = vtanh.f32 %v1646_v8  ;;  %2649 = vmatprep.subr.mxu0 %v5229_v18  ;;  %v4773_v57 = vpop.permute.xlu0 %1366  ;;  %v1642_v15 = vadd.f32 %v1598_v48, %v5285_v19  ;;  %v5292_v19 = vld [vmem:[#allocation70_spill] sm:$0xff] }
 0x36c   :  { %v3003_v24 = vpop.eup %3002  ;;  %3028 = vtanh.f32 %v984_v9  ;;  %2709 = vmatpush3.msra.mxu1 %v3001_v37  ;;  %2650 = vmatpush3.msra.mxu0 %v2999_v22 }
 0x36d   :  { %v3005_v26 = vpop.eup %3004  ;;  %3030 = vtanh.f32 %v1645_v25  ;;  %2748 = vmatprep.subr.mxu1 %v5229_v18  ;;  %2651 = vmatprep.subr.mxu0 %v5229_v18 }
 0x36e   :  { %v3007_v23 = vpop.eup %3006  ;;  %3032 = vtanh.f32 %v983_v29  ;;  %v1594_v5 = vpop.permute.xlu1 %1593  ;;  %2711 = vmatmul.mubr.f32.vlgmr.msra.gmra.mxu1 %v4609_v2  ;;  %2652 = vmatpush3.msra.mxu0 %v3005_v26 }
 0x36f   :  { %v3009_v38 = vpop.eup %3008  ;;  %3034 = vtanh.f32 %v1644_v61  ;;  %2749 = vmatpush3.msra.mxu1 %v3007_v23  ;;  %2653 = vmatprep.subr.mxu0 %v5229_v18  ;;  %v4785_v31 = vpop.permute.xlu0 %1370  ;;  %v1641_v13 = vadd.f32 %v1594_v5, %v5286_v44 }
 0x370   :  { %v3011_v16 = vpop.eup %3010  ;;  %3036 = vtanh.f32 %v982_v54  ;;  %2750 = vmatprep.subr.mxu1 %v5229_v18  ;;  %2654 = vmatpush3.msra.mxu0 %v3009_v38 }
 0x371   :  { %v4789_v42 = vpop.eup %3012  ;;  %3038 = vtanh.f32 %v1643_v33  ;;  %2751 = vmatpush3.msra.mxu1 %v3011_v16  ;;  %2655 = vmatprep.subr.mxu0 %v5229_v18  ;;  %v5293_v16 = vld [vmem:[#allocation72_spill] sm:$0xff] }
 0x372   :  { %v3015_v52 = vpop.eup %3014  ;;  %3040 = vtanh.f32 %v981_v45  ;;  %2752 = vmatprep.subr.mxu1 %v5229_v18  ;;  %v1590_v50 = vpop.permute.xlu1 %1589  ;;  %2656 = vmatpush3.msra.mxu0 %v3003_v24 }
 0x373   :  { %v3017_v34 = vpop.eup %3016  ;;  %3042 = vtanh.f32 %v1642_v15  ;;  %v1640_v40 = vadd.f32 %v1590_v50, %v5288_v6  ;;  %2753 = vmatpush3.msra.mxu1 %v3015_v52  ;;  %2657 = vmatprep.subr.mxu0 %v5229_v18  ;;  %v4797_v11 = vpop.permute.xlu0 %1374 }
 0x374   :  { %v3019_v49 = vpop.eup %3018  ;;  %3044 = vtanh.f32 %v1641_v13  ;;  %2754 = vmatprep.subr.mxu1 %v5229_v18  ;;  %2658 = vmatpush3.msra.mxu0 %v3017_v34  ;;  %v5294_v13 = vld [vmem:[#allocation68_spill] sm:$0xff]  ;;  %v5296_v34 = vld [vmem:[#allocation121_spill] sm:$0xff] }
 0x375   :  { %v3021_v28 = vpop.eup %3020  ;;  %3046 = vtanh.f32 %v1640_v40  ;;  %2755 = vmatpush3.msra.mxu1 %v3019_v49  ;;  %2659 = vmatprep.subr.mxu0 %v5229_v18  ;;  %v5297_v40 = vld [vmem:[#allocation73_spill] sm:$0xff] }
 0x376   :  { %v3023_v20 = vpop.eup %3022  ;;  %3048 = vtanh.f32 %v979_v56  ;;  %2756 = vmatprep.subr.mxu1 %v5229_v18  ;;  %v1586_v46 = vpop.permute.xlu1 %1585  ;;  %2660 = vmatpush3.msra.mxu0 %v3021_v28  ;;  %v5298_v28 = vld [vmem:[#allocation64_spill] sm:$0xff] }
 0x377   :  { %v3025_v39 = vpop.eup %3024  ;;  %v1639_v30 = vadd.f32 %v1586_v46, %v5289_v1  ;;  %2757 = vmatpush3.msra.mxu1 %v3023_v20  ;;  %2661 = vmatprep.subr.mxu0 %v5229_v18  ;;  %v4804_v0 = vpop.permute.xlu0 %1378 }
 0x378   :  { %v3027_v17 = vpop.eup %3026  ;;  %2758 = vmatprep.subr.mxu1 %v5229_v18  ;;  %2662 = vmatpush3.msra.mxu0 %v3025_v39  ;;  %v5299_v39 = vld [vmem:[#allocation62_spill] sm:$0xff] }
 0x379   :  { %v3029_v55 = vpop.eup %3028  ;;  %3050 = vtanh.f32 %v1639_v30  ;;  %2759 = vmatpush3.msra.mxu1 %v3027_v17  ;;  %2663 = vmatprep.subr.mxu0 %v5229_v18  ;;  %v5300_v30 = vld [vmem:[#allocation120_spill] sm:$0xff] }
 0x37a   :  { %v3031_v27 = vpop.eup %3030  ;;  %2760 = vmatprep.subr.mxu1 %v5229_v18  ;;  %v1582_v7 = vpop.permute.xlu1 %1581  ;;  %2664 = vmatpush3.msra.mxu0 %v3029_v55  ;;  %v5301_v55 = vld [vmem:[#allocation60_spill] sm:$0xff] }
 0x37b   :  { %v3033_v36 = vpop.eup %3032  ;;  %v1638_v32 = vadd.f32 %v1582_v7, %v5290_v58  ;;  %2761 = vmatpush3.msra.mxu1 %v3031_v27  ;;  %2665 = vmatprep.subr.mxu0 %v5229_v18  ;;  %v4811_v4 = vpop.permute.xlu0 %1382 }
 0x37c   :  { %v3035_v47 = vpop.eup %3034  ;;  %2762 = vmatprep.subr.mxu1 %v5229_v18  ;;  %2666 = vmatpush3.msra.mxu0 %v3033_v36  ;;  %v5302_v36 = vld [vmem:[#allocation119_spill] sm:$0xff] }
 0x37d   :  { %v3037_v8 = vpop.eup %3036  ;;  %3052 = vtanh.f32 %v1638_v32  ;;  %2763 = vmatpush3.msra.mxu1 %v3035_v47  ;;  %2667 = vmatprep.subr.mxu0 %v5229_v18  ;;  %v5303_v47 = vld [vmem:[#allocation58_spill] sm:$0xff] }
 0x37e   :  { %v3039_v51 = vpop.eup %3038  ;;  %2764 = vmatprep.subr.mxu1 %v5229_v18  ;;  %v1578_v12 = vpop.permute.xlu1 %1577  ;;  %2668 = vmatpush3.msra.mxu0 %v3037_v8  ;;  %v1425_v8 = vadd.f32 %v4655_v3, %v5303_v47  ;;  %v5308_v3 = vld [vmem:[#allocation116_spill] sm:$0xff] }
 0x37f   :  { %v3041_v9 = vpop.eup %3040  ;;  %v1637_v63 = vadd.f32 %v1578_v12, %v5291_v14  ;;  %2765 = vmatpush3.msra.mxu1 %v3039_v51  ;;  %2669 = vmatprep.subr.mxu0 %v5229_v18  ;;  %v1391_v25 = vpop.permute.xlu0 %1390  ;;  %v5304_v51 = vld [vmem:[#allocation118_spill] sm:$0xff] }
 0x380   :  { %v3043_v22 = vpop.eup %3042  ;;  %2766 = vmatprep.subr.mxu1 %v5229_v18  ;;  %2670 = vmatpush3.msra.mxu0 %v3041_v9  ;;  %v1426_v27 = vadd.f32 %v1391_v25, %v5301_v55  ;;  %v5305_v9 = vld [vmem:[#allocation56_spill] sm:$0xff]  ;;  %v5306_v25 = vld [vmem:[#allocation117_spill] sm:$0xff] }
 0x381   :  { %v3045_v59 = vpop.eup %3044  ;;  %3054 = vtanh.f32 %v1637_v63  ;;  %2767 = vmatpush3.msra.mxu1 %v3043_v22  ;;  %2671 = vmatprep.subr.mxu0 %v5229_v18  ;;  %v1424_v14 = vadd.f32 %v4811_v4, %v5305_v9 }
 0x382   :  { %v3047_v29 = vpop.eup %3046  ;;  %2768 = vmatprep.subr.mxu1 %v5229_v18  ;;  %2672 = vmatpush3.msra.mxu0 %v4789_v42 }
 0x383   :  { %v3049_v48 = vpop.eup %3048  ;;  %2769 = vmatpush3.msra.mxu1 %v3045_v59  ;;  %v2072_v37 = vpop.permute.xlu1 %2071  ;;  %2673 = vmatprep.subr.mxu0 %v5229_v18 }
 0x384   :  { %v1395_v35 = vpop.permute.xlu0 %1394  ;;  %2770 = vmatprep.subr.mxu1 %v5229_v18  ;;  %2674 = vmatpush3.msra.mxu0 %v3049_v48  ;;  %v2089_v6 = vadd.f32 %v2072_v37, %v5296_v34  ;;  %v5307_v48 = vld [vmem:[#allocation54_spill] sm:$0xff] }
 0x385   :  { %2771 = vmatpush3.msra.mxu1 %v3047_v29  ;;  %2676 = vmatmul.mubr.f32.vlgmr.msra.gmra.mxu0 %v4609_v2  ;;  %v1427_v1 = vadd.f32 %v1395_v35, %v5299_v39  ;;  %v1423_v37 = vadd.f32 %v4804_v0, %v5307_v48  ;;  %v5311_v0 = vld [vmem:[#allocation50_spill] sm:$0xff]  ;;  %v5323_v48 = vld [vmem:[#allocation109_spill] sm:$0xff] }
 0x386   :  { %v3051_v61 = vpop.eup %3050  ;;  %2772 = vmatprep.subr.mxu1 %v5229_v18  ;;  %2713 = vmatprep.subr.mxu0 %v5229_v18 }
 0x387   :  { %v2068_v24 = vpop.permute.xlu1 %2067  ;;  %2773 = vmatpush3.msra.mxu1 %v3051_v61  ;;  %2780 = vmatprep.mubr.msk.f32.mxu1 %vm3288_vm0, %v5229_v18 }
 0x388   :  { %v1399_v60 = vpop.permute.xlu0 %1398  ;;  %2774 = vmatprep.subr.mxu1 %v5229_v18  ;;  %2745 = vmatprep.mubr.msk.f32.mxu0 %vm3288_vm0, %v5229_v18  ;;  %v2088_v17 = vadd.f32 %v2068_v24, %v5300_v30  ;;  %v5309_v24 = vld [vmem:[#allocation52_spill] sm:$0xff] }
 0x389   :  { %v1428_v20 = vadd.f32 %v1399_v60, %v5298_v28  ;;  %v1422_v4 = vadd.f32 %v4797_v11, %v5309_v24  ;;  %v5312_v11 = vld [vmem:[#allocation114_spill] sm:$0xff] }
 0x38a   :  { %v3053_v54 = vpop.eup %3052 }
 0x38b   :  { %2775 = vmatpush3.msra.mxu1 %v3053_v54  ;;  %v5310_v54 = vld [vmem:[#allocation115_spill] sm:$0xff] }
 0x38c   :  { %v4832_v26 = vpop.permute.xlu1 %1844  ;;  %2776 = vmatprep.subr.mxu1 %v5229_v18 }
 0x38d   :  { %v1403_v43 = vpop.permute.xlu0 %1402 }
 0x38e   :  { %v3055_v33 = vpop.eup %3054  ;;  %v1429_v56 = vadd.f32 %v1403_v43, %v5295_v41 }
 0x38f   :  { %2777 = vmatpush3.msra.mxu1 %v3055_v33 }
 0x390   :  { %2778 = vmatprep.subr.mxu1 %v5229_v18 }
 0x391   :  { %v1407_v23 = vpop.permute.xlu0 %1406  ;;  %v2064_v10 = vpop.permute.xlu1 %2063 }
 0x392   :  { %v1430_v42 = vadd.f32 %v1407_v23, %v5294_v13  ;;  %v2087_v58 = vadd.f32 %v2064_v10, %v5302_v36  ;;  %v1421_v10 = vadd.f32 %v4785_v31, %v5311_v0  ;;  %v5327_v0 = vld [vmem:[#allocation94_spill] sm:$0xff] }
 0x395   :  { %v1411_v45 = vpop.permute.xlu0 %1410 }
 0x396   :  { %v1431_v15 = vadd.f32 %v1411_v45, %v5292_v19 }
 0x397   :  { %v4836_v5 = vpop.permute.xlu1 %1840 }
 0x399   :  { %v1415_v38 = vpop.permute.xlu0 %1414 }
 0x39a   :  { %v1432_v44 = vadd.f32 %v1415_v38, %v5293_v16 }
 0x39c   :  { %3056 = vtanh.f32 %v1432_v44  ;;  %v2060_v52 = vpop.permute.xlu1 %2059  ;;  %v5313_v44 = vld [vmem:[#allocation48_spill] sm:$0xff] }
 0x39d   :  { %3058 = vtanh.f32 %v1431_v15  ;;  %v2086_v12 = vadd.f32 %v2060_v52, %v5304_v51  ;;  %v1420_v13 = vadd.f32 %v4773_v57, %v5313_v44  ;;  %v5314_v52 = vld [vmem:[#allocation113_spill] sm:$0xff]  ;;  %v5321_v51 = vld [vmem:[#allocation102_spill] sm:$0xff]  ;;  %v5329_v44 = vld [vmem:[#allocation107_spill] sm:$0xff] }
 0x39e   :  { %v1574_v50 = vpop.permute.xlu0 %1573  ;;  %3060 = vtanh.f32 %v1430_v42 }
 0x39f   :  { %v1636_v49 = vadd.f32 %v1574_v50, %v5297_v40  ;;  %v5315_v50 = vld [vmem:[#allocation46_spill] sm:$0xff] }
 0x3a0   :  { %v2056_v46 = vpop.permute.xlu1 %2055  ;;  %v1419_v34 = vadd.f32 %v4761_v62, %v5315_v50  ;;  %v5331_v50 = vld [vmem:[#allocation88_spill] sm:$0xff] }
 0x3a1   :  { %3062 = vtanh.f32 %v1636_v49  ;;  %v2085_v22 = vadd.f32 %v2056_v46, %v5306_v25  ;;  %v5316_v49 = vld [vmem:[#allocation44_spill] sm:$0xff] }
 0x3a2   :  { %3064 = vtanh.f32 %v1429_v56  ;;  %v1418_v28 = vadd.f32 %v4749_v53, %v5316_v49  ;;  %v5322_v25 = vld [vmem:[#allocation100_spill] sm:$0xff] }
 0x3a3   :  { %3066 = vtanh.f32 %v2089_v6  ;;  %v4848_v7 = vpop.permute.xlu0 %1852 }
 0x3a4   :  { %3068 = vtanh.f32 %v1428_v20  ;;  %v2052_v32 = vpop.permute.xlu1 %2051  ;;  %v5317_v20 = vld [vmem:[#allocation111_spill] sm:$0xff] }
 0x3a5   :  { %3070 = vtanh.f32 %v1427_v1  ;;  %v2084_v35 = vadd.f32 %v2052_v32, %v5308_v3  ;;  %v5318_v1 = vld [vmem:[#allocation42_spill] sm:$0xff] }
 0x3a6   :  { %3072 = vtanh.f32 %v2088_v17  ;;  %v1417_v30 = vadd.f32 %v4736_v21, %v5318_v1  ;;  %v5320_v32 = vld [vmem:[#allocation110_spill] sm:$0xff]  ;;  %v5334_v1 = vld [vmem:[#allocation84_spill] sm:$0xff] }
 0x3a7   :  { %3074 = vtanh.f32 %v1426_v27  ;;  %v4856_v63 = vpop.permute.xlu0 %1848  ;;  %v5319_v27 = vld [vmem:[#allocation104_spill] sm:$0xff]  ;;  %v5324_v3 = vld [vmem:[#allocation98_spill] sm:$0xff] }
 0x3a8   :  { %3076 = vtanh.f32 %v2087_v58  ;;  %v2048_v59 = vpop.permute.xlu1 %2047  ;;  %v1870_v36 = vadd.f32 %v4848_v7, %v5319_v27 }
 0x3a9   :  { %v3057_v29 = vpop.eup %3056  ;;  %3078 = vtanh.f32 %v1425_v8  ;;  %v2083_v43 = vadd.f32 %v2048_v59, %v5310_v54 }
 0x3aa   :  { %3080 = vtanh.f32 %v2086_v12  ;;  %2714 = vmatpush3.msra.mxu0 %v3057_v29  ;;  %v3059_v61 = vpop.eup %3058  ;;  %v1869_v12 = vadd.f32 %v4856_v63, %v5321_v51 }
 0x3ab   :  { %3082 = vtanh.f32 %v1424_v14  ;;  %2715 = vmatprep.subr.mxu0 %v5229_v18  ;;  %v4865_v60 = vpop.permute.xlu0 %1836  ;;  %v3061_v23 = vpop.eup %3060 }
 0x3ac   :  { %3084 = vtanh.f32 %v2085_v22  ;;  %v2044_v33 = vpop.permute.xlu1 %2043  ;;  %2716 = vmatpush3.msra.mxu0 %v3059_v61  ;;  %v1868_v22 = vadd.f32 %v4832_v26, %v5322_v25 }
 0x3ad   :  { %3086 = vtanh.f32 %v1423_v37  ;;  %2717 = vmatprep.subr.mxu0 %v5229_v18  ;;  %v2082_v38 = vadd.f32 %v2044_v33, %v5312_v11 }
 0x3ae   :  { %v3063_v45 = vpop.eup %3062  ;;  %3088 = vtanh.f32 %v2084_v35  ;;  %2718 = vmatpush3.msra.mxu0 %v3061_v23  ;;  %v1867_v35 = vadd.f32 %v4836_v5, %v5324_v3  ;;  %v5326_v5 = vld [vmem:[#allocation108_spill] sm:$0xff] }
 0x3af   :  { %v3065_v19 = vpop.eup %3064  ;;  %3090 = vtanh.f32 %v1422_v4  ;;  %2719 = vmatprep.subr.mxu0 %v5229_v18  ;;  %2779 = vmatpush3.msra.mxu1 %v3063_v45  ;;  %v4873_v15 = vpop.permute.xlu0 %1832  ;;  %v5325_v4 = vld [vmem:[#allocation96_spill] sm:$0xff] }
 0x3b0   :  { %v3067_v16 = vpop.eup %3066  ;;  %3092 = vtanh.f32 %v2083_v43  ;;  %v2040_v31 = vpop.permute.xlu1 %2039  ;;  %2720 = vmatpush3.msra.mxu0 %v3065_v19  ;;  %2818 = vmatprep.subr.mxu1 %v5229_v18  ;;  %v1866_v54 = vadd.f32 %v4865_v60, %v5325_v4 }
 0x3b1   :  { %v3069_v42 = vpop.eup %3068  ;;  %3094 = vtanh.f32 %v1421_v10  ;;  %v2081_v41 = vadd.f32 %v2040_v31, %v5314_v52  ;;  %2721 = vmatprep.subr.mxu0 %v5229_v18  ;;  %2781 = vmatmul.mubr.f32.vlgmr.msra.gmra.mxu1 %v4609_v2  ;;  %v1865_v10 = vadd.f32 %v4873_v15, %v5327_v0  ;;  %v5330_v31 = vld [vmem:[#allocation90_spill] sm:$0xff] }
 0x3b2   :  { %v3071_v56 = vpop.eup %3070  ;;  %3096 = vtanh.f32 %v2082_v38  ;;  %2819 = vmatpush3.msra.mxu1 %v3067_v16  ;;  %2722 = vmatpush3.msra.mxu0 %v3069_v42  ;;  %v5328_v38 = vld [vmem:[#allocation92_spill] sm:$0xff] }
 0x3b3   :  { %v3073_v57 = vpop.eup %3072  ;;  %3098 = vtanh.f32 %v2081_v41  ;;  %2820 = vmatprep.subr.mxu1 %v5229_v18  ;;  %2723 = vmatprep.subr.mxu0 %v5229_v18  ;;  %v4885_v6 = vpop.permute.xlu0 %1828 }
 0x3b4   :  { %v3075_v40 = vpop.eup %3074  ;;  %3100 = vtanh.f32 %v1420_v13  ;;  %2821 = vmatpush3.msra.mxu1 %v3073_v57  ;;  %v2036_v2 = vpop.permute.xlu1 %2035  ;;  %2724 = vmatpush3.msra.mxu0 %v3071_v56  ;;  %v1864_v19 = vadd.f32 %v4885_v6, %v5328_v38 }
 0x3b5   :  { %v3077_v62 = vpop.eup %3076  ;;  %v2080_v46 = vadd.f32 %v2036_v2, %v5317_v20  ;;  %2822 = vmatprep.subr.mxu1 %v5229_v18  ;;  %2725 = vmatprep.subr.mxu0 %v5229_v18  ;;  %3102 = vtanh.f32 %v1419_v34  ;;  %v5333_v2 = vld [vmem:[#allocation86_spill] sm:$0xff] }
 0x3b6   :  { %v3079_v39 = vpop.eup %3078  ;;  %2823 = vmatpush3.msra.mxu1 %v3077_v62  ;;  %2726 = vmatpush3.msra.mxu0 %v3075_v40  ;;  %v5332_v40 = vld [vmem:[#allocation106_spill] sm:$0xff] }
 0x3b7   :  { %v3081_v17 = vpop.eup %3080  ;;  %3104 = vtanh.f32 %v2080_v46  ;;  %2824 = vmatprep.subr.mxu1 %v5229_v18  ;;  %2727 = vmatprep.subr.mxu0 %v5229_v18  ;;  %v4896_v53 = vpop.permute.xlu0 %1824 }
 0x3b8   :  { %v3083_v55 = vpop.eup %3082  ;;  %3106 = vtanh.f32 %v1418_v28  ;;  %2825 = vmatpush3.msra.mxu1 %v3081_v17  ;;  %v2032_v58 = vpop.permute.xlu1 %2031  ;;  %2728 = vmatpush3.msra.mxu0 %v3079_v39  ;;  %v1863_v42 = vadd.f32 %v4896_v53, %v5330_v31  ;;  %v4940_v28 = vld [vmem:[%s4996_s6] sm:$0x1]  ;;  %s3298_s6 = smov [#allocation10]  }
 0x3b9   :  { %v3085_v21 = vpop.eup %3084  ;;  %v2079_v47 = vadd.f32 %v2032_v58, %v5320_v32  ;;  %2826 = vmatprep.subr.mxu1 %v5229_v18  ;;  %2729 = vmatprep.subr.mxu0 %v5229_v18  ;;  %3108 = vtanh.f32 %v1417_v30  ;;  %s2187_s28 = sshll.u32 %s3298_s6, 4  ;;  %s2188_s28 = int_to_ptr.vmem [resolvable:$true] %s2187_s28 }
 0x3ba   :  { %v3087_v8 = vpop.eup %3086  ;;  %2827 = vmatpush3.msra.mxu1 %v3085_v21  ;;  %2730 = vmatpush3.msra.mxu0 %v3083_v55  ;;  %v5335_v55 = vld [vmem:[#allocation105_spill] sm:$0xff]  ;;  %s3251_s3 = scalar_lea.vmem %s2188_s28, 128  ;;  %p3256_p7 = scmp.lt.s32.totalorder %s2188_s28, %s2188_s28 }
 0x3bb   :  { %v3089_v9 = vpop.eup %3088  ;;  %3110 = vtanh.f32 %v2079_v47  ;;  %2828 = vmatprep.subr.mxu1 %v5229_v18  ;;  %2731 = vmatprep.subr.mxu0 %v5229_v18  ;;  %v1821_v7 = vpop.permute.xlu0 %1820  ;;  %p3252_p6 = scmp.ne.s32.totalorder %s2188_s28, %s3251_s3  ;;  %p3257_p8 = scmp.lt.s32.totalorder %s3251_s3, %s3251_s3 }
 0x3bc   :  { %v3091_v14 = vpop.eup %3090  ;;  %3112 = vtanh.f32 %v1870_v36  ;;  %2829 = vmatpush3.msra.mxu1 %v3089_v9  ;;  %v2028_v59 = vpop.permute.xlu1 %2027  ;;  %2732 = vmatpush3.msra.mxu0 %v3087_v8  ;;  %v1862_v34 = vadd.f32 %v1821_v7, %v5331_v50  ;;  %v5336_v36 = vld [vmem:[#allocation82_spill] sm:$0xff]  ;;  %v5337_v8 = vld [vmem:[#allocation80_spill] sm:$0xff] }
 0x3bd   :  { %v3093_v29 = vpop.eup %3092  ;;  %v2078_v63 = vadd.f32 %v2028_v59, %v5323_v48  ;;  %2830 = vmatprep.subr.mxu1 %v5229_v18  ;;  %2733 = vmatprep.subr.mxu0 %v5229_v18  ;;  %3114 = vtanh.f32 %v1869_v12  ;;  %v5338_v9 = vld [vmem:[#allocation78_spill] sm:$0xff]  ;;  %v5339_v59 = vld [vmem:[#allocation76_spill] sm:$0xff]  ;;  %p3258_p9 = por %p3257_p8, %p3256_p7 }
 0x3be   :  { %v3095_v37 = vpop.eup %3094  ;;  %2831 = vmatpush3.msra.mxu1 %v3093_v29  ;;  %2734 = vmatpush3.msra.mxu0 %v3091_v14 }
 0x3bf   :  { %v3097_v61 = vpop.eup %3096  ;;  %3116 = vtanh.f32 %v2078_v63  ;;  %2832 = vmatprep.subr.mxu1 %v5229_v18  ;;  %2735 = vmatprep.subr.mxu0 %v5229_v18  ;;  %v1817_v26 = vpop.permute.xlu0 %1816  ;;  %p3259_p10 = pnand %p3258_p9, %p3252_p6 }
 0x3c0   :  { %v3099_v24 = vpop.eup %3098  ;;  %3118 = vtanh.f32 %v1868_v22  ;;  %2833 = vmatpush3.msra.mxu1 %v3097_v61  ;;  %v2024_v43 = vpop.permute.xlu1 %2023  ;;  %2736 = vmatpush3.msra.mxu0 %v3095_v37  ;;  %v1861_v62 = vadd.f32 %v1817_v26, %v5333_v2 }
 0x3c1   :  { %v3101_v33 = vpop.eup %3100  ;;  %v2077_v23 = vadd.f32 %v2024_v43, %v5326_v5  ;;  %2834 = vmatprep.subr.mxu1 %v5229_v18  ;;  %2737 = vmatprep.subr.mxu0 %v5229_v18  ;;  %3120 = vtanh.f32 %v1867_v35  ;;  %v5340_v35 = vld [vmem:[#allocation74_spill] sm:$0xff] }
 0x3c2   :  { %2835 = vmatpush3.msra.mxu1 %v3099_v24  ;;  %2738 = vmatpush3.msra.mxu0 %v3101_v33  ;;  %v3103_v45 = vpop.eup %3102 }
 0x3c3   :  { %3122 = vtanh.f32 %v2077_v23  ;;  %2739 = vmatprep.subr.mxu0 %v5229_v18  ;;  %v1813_v60 = vpop.permute.xlu0 %1812  ;;  %2836 = vmatprep.subr.mxu1 %v5229_v18 }
 0x3c4   :  { %v3105_v11 = vpop.eup %3104  ;;  %3124 = vtanh.f32 %v1866_v54  ;;  %v2020_v16 = vpop.permute.xlu1 %2019  ;;  %2740 = vmatpush3.msra.mxu0 %v3103_v45  ;;  %2850 = vmatprep.mubr.msk.f32.mxu1 %vm3288_vm0, %v5229_v18  ;;  %v1860_v30 = vadd.f32 %v1813_v60, %v5334_v1 }
 0x3c5   :  { %v3107_v15 = vpop.eup %3106  ;;  %v2076_v13 = vadd.f32 %v2020_v16, %v5329_v44  ;;  %2741 = vmatprep.subr.mxu0 %v5229_v18  ;;  %2837 = vmatpush3.msra.mxu1 %v3105_v11  ;;  %3126 = vtanh.f32 %v1865_v10 }
 0x3c6   :  { %2742 = vmatpush3.msra.mxu0 %v3107_v15  ;;  %2838 = vmatprep.subr.mxu1 %v5229_v18  ;;  %v3109_v52 = vpop.eup %3108 }
 0x3c7   :  { %3128 = vtanh.f32 %v2076_v13  ;;  %2743 = vmatprep.subr.mxu0 %v5229_v18  ;;  %v1809_v41 = vpop.permute.xlu0 %1808 }
 0x3c8   :  { %v3111_v56 = vpop.eup %3110  ;;  %3130 = vtanh.f32 %v1864_v19  ;;  %v2016_v57 = vpop.permute.xlu1 %2015  ;;  %2744 = vmatpush3.msra.mxu0 %v3109_v52  ;;  %v1859_v58 = vadd.f32 %v1809_v41, %v5336_v36 }
 0x3c9   :  { %v3113_v6 = vpop.eup %3112  ;;  %v2075_v49 = vadd.f32 %v2016_v57, %v5332_v40  ;;  %2746 = vmatmul.mubr.f32.vlgmr.msra.gmra.mxu0 %v4940_v28  ;;  %2783 = vmatprep.subr.mxu0 %v5229_v18  ;;  %3132 = vtanh.f32 %v1863_v42 }
 0x3ca   :  { %2839 = vmatpush3.msra.mxu1 %v3111_v56  ;;  %2784 = vmatpush3.msra.mxu0 %v3113_v6  ;;  %v3115_v20 = vpop.eup %3114 }
 0x3cb   :  { %3134 = vtanh.f32 %v2075_v49  ;;  %2785 = vmatprep.subr.mxu0 %v5229_v18  ;;  %v1805_v46 = vpop.permute.xlu0 %1804  ;;  %2840 = vmatprep.subr.mxu1 %v5229_v18 }
 0x3cc   :  { %v3117_v39 = vpop.eup %3116  ;;  %3136 = vtanh.f32 %v1862_v34  ;;  %v2012_v17 = vpop.permute.xlu1 %2011  ;;  %2786 = vmatpush3.msra.mxu0 %v3115_v20  ;;  %2815 = vmatprep.mubr.msk.f32.mxu0 %vm3288_vm0, %v5229_v18  ;;  %v1858_v51 = vadd.f32 %v1805_v46, %v5337_v8 }
 0x3cd   :  { %v3119_v53 = vpop.eup %3118  ;;  %v2074_v27 = vadd.f32 %v2012_v17, %v5335_v55  ;;  %2787 = vmatprep.subr.mxu0 %v5229_v18  ;;  %2841 = vmatpush3.msra.mxu1 %v3117_v39  ;;  %3138 = vtanh.f32 %v1861_v62 }
 0x3ce   :  { %2788 = vmatpush3.msra.mxu0 %v3119_v53  ;;  %2842 = vmatprep.subr.mxu1 %v5229_v18  ;;  %v3121_v21 = vpop.eup %3120 }
 0x3cf   :  { %3140 = vtanh.f32 %v2074_v27  ;;  %2789 = vmatprep.subr.mxu0 %v5229_v18  ;;  %v1801_v32 = vpop.permute.xlu0 %1800 }
 0x3d0   :  { %v3123_v47 = vpop.eup %3122  ;;  %3142 = vtanh.f32 %v1860_v30  ;;  %2790 = vmatpush3.msra.mxu0 %v3121_v21  ;;  %v1857_v7 = vadd.f32 %v1801_v32, %v5338_v9 }
 0x3d1   :  { %v3125_v12 = vpop.eup %3124  ;;  %2791 = vmatprep.subr.mxu0 %v5229_v18  ;;  %2843 = vmatpush3.msra.mxu1 %v3123_v47  ;;  %3144 = vtanh.f32 %v1859_v58 }
 0x3d2   :  { %2792 = vmatpush3.msra.mxu0 %v3125_v12  ;;  %2844 = vmatprep.subr.mxu1 %v5229_v18  ;;  %v3127_v14 = vpop.eup %3126  ;;  %3146 = vtanh.f32 %v1858_v51 }
 0x3d3   :  { %2793 = vmatprep.subr.mxu0 %v5229_v18  ;;  %v1797_v25 = vpop.permute.xlu0 %1796  ;;  %3148 = vtanh.f32 %v1857_v7 }
 0x3d4   :  { %v3129_v22 = vpop.eup %3128  ;;  %v1856_v29 = vadd.f32 %v1797_v25, %v5339_v59  ;;  %2794 = vmatpush3.msra.mxu0 %v3127_v14 }
 0x3d5   :  { %v3131_v48 = vpop.eup %3130  ;;  %2795 = vmatprep.subr.mxu0 %v5229_v18  ;;  %2845 = vmatpush3.msra.mxu1 %v3129_v22 }
 0x3d6   :  { %2796 = vmatpush3.msra.mxu0 %v3131_v48  ;;  %2846 = vmatprep.subr.mxu1 %v5229_v18  ;;  %v3133_v63 = vpop.eup %3132  ;;  %3150 = vtanh.f32 %v1856_v29 }
 0x3d7   :  { %2797 = vmatprep.subr.mxu0 %v5229_v18  ;;  %v1793_v37 = vpop.permute.xlu0 %1792 }
 0x3d8   :  { %v3135_v3 = vpop.eup %3134  ;;  %v1855_v61 = vadd.f32 %v1793_v37, %v5340_v35  ;;  %2798 = vmatpush3.msra.mxu0 %v3133_v63 }
 0x3d9   :  { %v3137_v26 = vpop.eup %3136  ;;  %2799 = vmatprep.subr.mxu0 %v5229_v18  ;;  %2847 = vmatpush3.msra.mxu1 %v3135_v3 }
 0x3da   :  { %3152 = vtanh.f32 %v1855_v61  ;;  %2800 = vmatpush3.msra.mxu0 %v3137_v26  ;;  %2848 = vmatprep.subr.mxu1 %v5229_v18  ;;  %v3139_v24 = vpop.eup %3138 }
 0x3db   :  { %2801 = vmatprep.subr.mxu0 %v5229_v18 }
 0x3dc   :  { %v3141_v4 = vpop.eup %3140  ;;  %2802 = vmatpush3.msra.mxu0 %v3139_v24 }
 0x3dd   :  { %v3143_v54 = vpop.eup %3142  ;;  %2803 = vmatprep.subr.mxu0 %v5229_v18  ;;  %2849 = vmatpush3.msra.mxu1 %v3141_v4 }
 0x3de   :  { %2804 = vmatpush3.msra.mxu0 %v3143_v54  ;;  %2851 = vmatmul.mubr.f32.vlgmr.msra.gmra.mxu1 %v4940_v28  ;;  %v3145_v43 = vpop.eup %3144 }
 0x3df   :  { %2805 = vmatprep.subr.mxu0 %v5229_v18  ;;  %v3147_v33 = vpop.eup %3146 }
 0x3e0   :  { %2806 = vmatpush3.msra.mxu0 %v3145_v43  ;;  %v3149_v5 = vpop.eup %3148 }
 0x3e1   :  { %2807 = vmatprep.subr.mxu0 %v5229_v18 }
 0x3e2   :  { %2808 = vmatpush3.msra.mxu0 %v3147_v33 }
 0x3e3   :  { %2809 = vmatprep.subr.mxu0 %v5229_v18  ;;  %v3151_v23 = vpop.eup %3150 }
 0x3e4   :  { %2810 = vmatpush3.msra.mxu0 %v3149_v5 }
 0x3e5   :  { %2811 = vmatprep.subr.mxu0 %v5229_v18 }
 0x3e6   :  { %2812 = vmatpush3.msra.mxu0 %v3151_v23 }
 0x3e7   :  { %v3153_v0 = vpop.eup %3152  ;;  %2813 = vmatprep.subr.mxu0 %v5229_v18 }
 0x3e8   :  { %2814 = vmatpush3.msra.mxu0 %v3153_v0 }
 0x3e9   :  { %2816 = vmatmul.mubr.f32.vlgmr.msra.gmra.mxu0 %v4940_v28 }
 0x3ee   :  { %v639_v10 = vpop.f32.mrf.mxu0 }
 0x3ef   :  { %3154 = vtanh.f32 %v639_v10 }
 0x3f0   :  { %v2607_v45 = vpop.f32.mrf.mxu0 }
 0x3fc   :  { %v3155_v60 = vpop.eup %3154 }
 0x3fd   :  { %v644_v11 = vmul.f32 10.0, %v3155_v60 }
 0x3ff   :  { %646 = vst.msk [vmem:[#allocation10] sm:$0x1] %vm645_vm2, %v644_v11 }
 0x40a   :  { %v858_v38 = vpop.f32.mrf.mxu1 }
 0x40b   :  { %3156 = vtanh.f32 %v858_v38 }
 0x40c   :  { %v2642_v19 = vpop.f32.mrf.mxu1 }
 0x418   :  { %v3157_v16 = vpop.eup %3156 }
 0x419   :  { %v863_v15 = vmul.f32 10.0, %v3157_v16 }
 0x41b   :  { %865 = vst.msk [vmem:[#allocation10 + $0x1] sm:$0x1] %vm645_vm2, %v863_v15 }
 0x42e   :  { %v1296_v44 = vpop.f32.mrf.mxu1 }
 0x42f   :  { %3158 = vtanh.f32 %v1296_v44 }
 0x430   :  { %v2712_v18 = vpop.f32.mrf.mxu1 }
 0x43c   :  { %v3159_v13 = vpop.eup %3158 }
 0x43d   :  { %v1301_v31 = vmul.f32 10.0, %v3159_v13 }
 0x43f   :  { %1303 = vst.msk [vmem:[#allocation10 + $0x3] sm:$0x1] %vm645_vm2, %v1301_v31 }
 0x445   :  { %v1077_v42 = vpop.f32.mrf.mxu0 }
 0x446   :  { %3160 = vtanh.f32 %v1077_v42 }
 0x447   :  { %v2677_v52 = vpop.f32.mrf.mxu0 }
 0x453   :  { %v3161_v41 = vpop.eup %3160 }
 0x454   :  { %v1082_v56 = vmul.f32 10.0, %v3161_v41 }
 0x456   :  { %1084 = vst.msk [vmem:[#allocation10 + $0x2] sm:$0x1] %vm645_vm2, %v1082_v56 }
 0x471   :  { %v1734_v50 = vpop.f32.mrf.mxu1 }
 0x472   :  { %3162 = vtanh.f32 %v1734_v50 }
 0x473   :  { %v2782_v34 = vpop.f32.mrf.mxu1 }
 0x47f   :  { %v3163_v57 = vpop.eup %3162 }
 0x480   :  { %v1739_v6 = vmul.f32 10.0, %v3163_v57 }
 0x482   :  { %1741 = vst.msk [vmem:[#allocation10 + $0x5] sm:$0x1] %vm645_vm2, %v1739_v6 }
 0x489   :  { %v1515_v40 = vpop.f32.mrf.mxu0 }
 0x48a   :  { %3164 = vtanh.f32 %v1515_v40 }
 0x48b   :  { %v2747_v49 = vpop.f32.mrf.mxu0 }
 0x497   :  { %v3165_v28 = vpop.eup %3164 }
 0x498   :  { %v1520_v2 = vmul.f32 10.0, %v3165_v28 }
 0x49a   :  { %1522 = vst.msk [vmem:[#allocation10 + $0x4] sm:$0x1] %vm645_vm2, %v1520_v2 }
 0x49e   :  { %v2172_v62 = vpop.f32.mrf.mxu1 }
 0x49f   :  { %3166 = vtanh.f32 %v2172_v62 }
 0x4a0   :  { %v2852_v20 = vpop.f32.mrf.mxu1 }
 0x4a9   :  { %v1953_v46 = vpop.f32.mrf.mxu0 }
 0x4aa   :  { %3168 = vtanh.f32 %v1953_v46 }
 0x4ab   :  { %v2817_v39 = vpop.f32.mrf.mxu0 }
 0x4ac   :  { %v3167_v1 = vpop.eup %3166 }
 0x4ad   :  { %v2177_v30 = vmul.f32 10.0, %v3167_v1 }
 0x4af   :  { %2179 = vst.msk [vmem:[#allocation10 + $0x7] sm:$0x1] %vm645_vm2, %v2177_v30 }
 0x4b7   :  { %v3169_v17 = vpop.eup %3168 }
 0x4b8   :  { %v1958_v53 = vmul.f32 10.0, %v3169_v17 }
 0x4ba   :  { %1960 = vst.msk [vmem:[#allocation10 + $0x6] sm:$0x1] %vm645_vm2, %v1958_v53 }
 0x4bb   :  { %3262 = shalt.err (!%p3259_p10)
}
 0x4bc   :  { %2193 = dma.vmem_to_hbm [thread:$0]  %s2188_s28, 128, %s4998_s8, [#allocation4], %s3283_s15, %s3283_s15, %s3284_s16  }
 0x4bd   :  { %3277 = dma.done.wait [#allocation4], 128  }
 0x4be   :  { %3278 = vsyncadd [#allocation4], 4294967168 }
 0x4bf   :  { %2199 = vsyncpa [#allocation3], 1 }
 0x4c0   :  { %2200 = vsyncpa [#allocation6], 1 }
 0x4c1   :  { %2201 = vsyncpa [#allocation9], 1 }
 0x4c2   :  { %2202 = vsyncpa [#allocation4], 1 }

</bundles_post_ra>
